<compile_context>
chip_gen: v7x
topology: tpu7x:2x2x1
jax: 0.10.0
libtpu: 0.0.40
codegen_flags: <defaults>
</compile_context>

<pallas_src>
import functools

import jax
import jax.numpy as jnp
import numpy as np
from jax import lax
from jax.experimental import pallas as pl
from jax.experimental.pallas import tpu as pltpu


def _round_up(x, m):
    return (x + m - 1) // m * m


def _padded_channel_map(G0, G, n_groups, S0, Sg):
    """Padded-row -> real-channel index (-1 = zero pad row) for the 16-aligned
    channel-group layout: [x (G0 rows -> S0)] + n_groups * [conv out (G -> Sg)]."""
    idx = list(range(G0)) + [-1] * (S0 - G0)
    for j in range(n_groups):
        idx += [G0 + j * G + r for r in range(G)] + [-1] * (Sg - G)
    return np.asarray(idx, np.int32)


def _pack_conv_weight(w, idx):
    """w: (G, Cin, 3, 3) torch OIHW -> (9, G, cinp) bf16 tap-major matrices in
    the group-aligned padded channel layout (zero columns for pad rows)."""
    g_out, cin = w.shape[0], w.shape[1]
    sel = np.maximum(idx, 0)
    keep = jnp.asarray(idx >= 0)[None, None, :]
    wt = jnp.transpose(w, (2, 3, 0, 1)).reshape(9, g_out, cin)  # tap = ky*3 + kx
    wp = jnp.where(keep, wt[:, :, sel], 0.0)                    # (9, G, cinp)
    return wp.astype(jnp.bfloat16)


def _rdb_fused_kernel(*refs, Wp, G0, C, G, S0, Sg, GUARD, Sp_pad):
    """Fused RDB forward for one batch element.

    refs layout:
      [0]          x_ref    (1, G0, Sp_pad)   spatially pre-padded, lane-flattened, f32
      [1]          mask_ref (1, Sp_pad)       1.0 interior pixel, 0.0 pad / extra lane
      [2 .. 2+2C)  per conv layer: w_ref (9, G, cinp_i) bf16, b_ref (G, 1) f32
      [2+2C]       lffw_ref (G0, G0+C*G) bf16
      [3+2C]       lffb_ref (G0, 1) f32
      [4+2C]       o_ref    (1, G0, Sp_pad)
      [5+2C]       f_ref    (S0+(C-1)*Sg, SPE) bf16   VMEM-resident feature map
    """
    x_ref, mask_ref = refs[0], refs[1]
    conv_refs = refs[2:2 + 2 * C]
    lffw_ref = refs[2 + 2 * C]
    lffb_ref = refs[3 + 2 * C]
    o_ref = refs[4 + 2 * C]
    f_ref = refs[5 + 2 * C]

    spe = f_ref.shape[1]

    # Zero ONLY the pad-channel rows (never written; must be exactly zero so the
    # zero weight columns cannot turn stale NaN/Inf VMEM into NaN conv outputs).
    # Guard / beyond-plane lanes are handled by the NaN-safe select below.
    if S0 > G0:
        f_ref[pl.ds(G0, S0 - G0), :] = jnp.zeros((S0 - G0, spe), jnp.bfloat16)
    if Sg > G:
        for j in range(C - 1):
            f_ref[pl.ds(S0 + j * Sg + G, Sg - G), :] = jnp.zeros((Sg - G, spe),
                                                                 jnp.bfloat16)

    interior = mask_ref[...] > 0.5          # (1, Sp_pad) bool, broadcasts over chans

    x32 = x_ref[0]                          # (G0, Sp_pad) f32
    x_bf = x32.astype(jnp.bfloat16)
    f_ref[pl.ds(0, G0), pl.ds(GUARD, Sp_pad)] = x_bf      # 128-aligned store

    # LFF (1x1 conv) accumulated on the fly in f32: x-group contribution first.
    lff = jnp.dot(lffw_ref[:, 0:G0], x_bf, preferred_element_type=jnp.float32)

    for i in range(C):
        cinp = S0 + i * Sg                  # padded input channels (multiple of 16)
        w_ref = conv_refs[2 * i]            # (9, G, cinp) bf16
        b_ref = conv_refs[2 * i + 1]        # (G, 1) f32

        # 3x3 conv = 9 accumulating matmuls on shifted views of the resident
        # feature map (no im2col materialization, single accumulation chain).
        y = None
        for ky in range(3):
            for kx in range(3):
                t = ky * 3 + kx
                delta = (ky - 1) * Wp + (kx - 1)
                part = jnp.dot(
                    w_ref[t],
                    f_ref[pl.ds(0, cinp), pl.ds(GUARD + delta, Sp_pad)],
                    preferred_element_type=jnp.float32)
                y = part if y is None else y + part

        y = jnp.maximum(y + b_ref[...], 0.0)        # bias + ReLU
        y = jnp.where(interior, y, 0.0)             # keep pad ring exactly zero (NaN-safe)
        y_bf = y.astype(jnp.bfloat16)

        # torch.cat((x, out), dim=1): append as the next channel group.  The
        # last group only feeds the LFF, so it never touches VMEM.
        if i + 1 < C:
            f_ref[pl.ds(S0 + i * Sg, G), pl.ds(GUARD, Sp_pad)] = y_bf

        lff = lff + jnp.dot(lffw_ref[:, G0 + i * G:G0 + (i + 1) * G], y_bf,
                            preferred_element_type=jnp.float32)

    # LFF bias + residual add with the full-precision input; lane-dense store.
    o_ref[0] = (lff + lffb_ref[...] + x32).astype(o_ref.dtype)


def rdb_forward_nchw(params, x_nchw):
    """Fused Pallas RDB forward; matches PyTorch RDB.forward on NCHW input."""
    N, G0, H, W = x_nchw.shape
    C = len(params["convs"])
    G = params["convs"][0][0].shape[0]

    Hp, Wp = H + 2, W + 2
    Sp = Hp * Wp                               # padded spatial plane, lane-flattened
    Sp_pad = _round_up(Sp, 128)                # lane-dense stores / output DMA
    GUARD = _round_up(Wp + 1, 128)             # >= max |tap shift|, 128-aligned
    SPE = GUARD + Sp_pad + GUARD
    S0, Sg = _round_up(G0, 16), _round_up(G, 16)   # bf16 sublane packing
    Ctot_store = S0 + (C - 1) * Sg             # last conv group is never stored

    # One XLA pad/reshape/pad fusion: spatial zero pad once for the whole block,
    # flatten the padded plane into the lane dim, round lanes up to 128.
    xp = jnp.pad(x_nchw, ((0, 0), (0, 0), (1, 1), (1, 1))).reshape(N, G0, Sp)
    xf = jnp.pad(xp, ((0, 0), (0, 0), (0, Sp_pad - Sp)))

    # Interior-pixel mask in flattened padded coordinates.
    m = np.zeros((Hp, Wp), np.float32)
    m[1:H + 1, 1:W + 1] = 1.0
    mask = jnp.asarray(np.pad(m.reshape(1, Sp), ((0, 0), (0, Sp_pad - Sp))))

    conv_ops, conv_specs = [], []
    for i, (w, b) in enumerate(params["convs"]):
        idx = _padded_channel_map(G0, G, i, S0, Sg)
        wf = _pack_conv_weight(w, idx)                          # (9, G, cinp_i) bf16
        conv_ops += [wf, b.reshape(G, 1).astype(jnp.float32)]
        conv_specs += [pl.BlockSpec(wf.shape, lambda n: (0, 0, 0)),
                       pl.BlockSpec((G, 1), lambda n: (0, 0))]

    lff_w = params["lff_w"].astype(jnp.bfloat16)                # (G0, G0 + C*G)
    lff_b = params["lff_b"].reshape(G0, 1).astype(jnp.float32)

    kernel = functools.partial(_rdb_fused_kernel, Wp=Wp, G0=G0, C=C, G=G,
                               S0=S0, Sg=Sg, GUARD=GUARD, Sp_pad=Sp_pad)

    out = pl.pallas_call(
        kernel,
        out_shape=jax.ShapeDtypeStruct((N, G0, Sp_pad), x_nchw.dtype),
        grid_spec=pltpu.PrefetchScalarGridSpec(
            num_scalar_prefetch=0,
            grid=(N,),
            in_specs=[pl.BlockSpec((1, G0, Sp_pad), lambda n: (n, 0, 0)),
                      pl.BlockSpec((1, Sp_pad), lambda n: (0, 0))]
                     + conv_specs
                     + [pl.BlockSpec(lff_w.shape, lambda n: (0, 0)),
                        pl.BlockSpec((G0, 1), lambda n: (0, 0))],
            out_specs=pl.BlockSpec((1, G0, Sp_pad), lambda n: (n, 0, 0)),
            scratch_shapes=[pltpu.VMEM((Ctot_store, SPE), jnp.bfloat16)],
        ),
        compiler_params=pltpu.CompilerParams(
            dimension_semantics=("parallel",),
            vmem_limit_bytes=48 * 1024 * 1024),
    )(xf, mask, *conv_ops, lff_w, lff_b)

    # Un-flatten / un-pad the lane-dense output back to NCHW.
    return out[:, :, :Sp].reshape(N, G0, Hp, Wp)[:, :, 1:H + 1, 1:W + 1]


# ---------------------------------------------------------------------------
# Parameters (PyTorch layout) + pure-JAX f32 reference for correctness check
# ---------------------------------------------------------------------------
def init_rdb_params(key, G0, C, G, dtype=jnp.float32):
    """conv weights: (G, Cin, 3, 3) (torch OIHW), biases (G,); LFF: (G0, G0+C*G)."""
    params = {"convs": []}
    for i in range(C):
        cin = G0 + i * G
        key, kw, kb = jax.random.split(key, 3)
        w = jax.random.normal(kw, (G, cin, 3, 3), dtype) * 0.05
        b = jax.random.normal(kb, (G,), dtype) * 0.05
        params["convs"].append((w, b))
    key, kw, kb = jax.random.split(key, 3)
    params["lff_w"] = jax.random.normal(kw, (G0, G0 + C * G), dtype) * 0.05
    params["lff_b"] = jax.random.normal(kb, (G0,), dtype) * 0.05
    return params


def rdb_reference_nchw(params, x):
    feat = x
    for (w, b) in params["convs"]:
        out = lax.conv_general_dilated(
            feat, w, window_strides=(1, 1), padding="SAME",
            dimension_numbers=("NCHW", "OIHW", "NCHW"))
        out = jax.nn.relu(out + b[None, :, None, None])
        feat = jnp.concatenate([feat, out], axis=1)
    y = jnp.einsum("nchw,oc->nohw", feat, params["lff_w"])
    y = y + params["lff_b"][None, :, None, None]
    return y + x


if __name__ == "__main__":
    G0, C, G = 4, 3, 4
    N, H, W = 2, 16, 16

    key = jax.random.PRNGKey(0)
    key, kp, kx = jax.random.split(key, 3)
    params = init_rdb_params(kp, G0, C, G)
    x = jax.random.normal(kx, (N, G0, H, W), jnp.float32)   # NCHW, like PyTorch

    fwd = jax.jit(rdb_forward_nchw)
    out = jax.block_until_ready(fwd(params, x))

    ref = jax.block_until_ready(rdb_reference_nchw(params, x))
    # bf16 taps/weights with f32 accumulation: loosened tolerance vs f32 reference.
    np.testing.assert_allclose(np.asarray(out), np.asarray(ref),
                               atol=3e-2, rtol=3e-2)
    assert out.shape == (N, G0, H, W)

    print("KERNEL_OK")
</pallas_src>

<mosaic_0001>
module attributes {stable_mosaic.version = 11 : i64} {
  func.func @_rdb_fused_kernel(%arg0: i32, %arg1: memref<1x4x384xf32, #tpu.memory_space<vmem>>, %arg2: memref<1x384xf32, #tpu.memory_space<vmem>>, %arg3: memref<9x4x16xbf16, #tpu.memory_space<vmem>>, %arg4: memref<4x1xf32, #tpu.memory_space<vmem>>, %arg5: memref<9x4x32xbf16, #tpu.memory_space<vmem>>, %arg6: memref<4x1xf32, #tpu.memory_space<vmem>>, %arg7: memref<9x4x48xbf16, #tpu.memory_space<vmem>>, %arg8: memref<4x1xf32, #tpu.memory_space<vmem>>, %arg9: memref<4x16xbf16, #tpu.memory_space<vmem>>, %arg10: memref<4x1xf32, #tpu.memory_space<vmem>>, %arg11: memref<1x4x384xf32, #tpu.memory_space<vmem>>, %arg12: memref<48x640xbf16, #tpu.memory_space<vmem>>) attributes {dimension_semantics = [#tpu.dimension_semantics<parallel>], iteration_bounds = array<i64: 2>, scalar_prefetch = 0 : i64, scratch_operands = 1 : i64, tpu.core_type = #tpu.core_type<tc>, window_params = [{transform_indices = @transform_0, window_bounds = array<i64: 1, 4, 384>}, {pipeline_mode = #tpu.pipeline_mode<synchronous>, transform_indices = @transform_1, window_bounds = array<i64: 1, 384>}, {pipeline_mode = #tpu.pipeline_mode<synchronous>, transform_indices = @transform_2, window_bounds = array<i64: 9, 4, 16>}, {pipeline_mode = #tpu.pipeline_mode<synchronous>, transform_indices = @transform_3, window_bounds = array<i64: 4, 1>}, {pipeline_mode = #tpu.pipeline_mode<synchronous>, transform_indices = @transform_4, window_bounds = array<i64: 9, 4, 32>}, {pipeline_mode = #tpu.pipeline_mode<synchronous>, transform_indices = @transform_5, window_bounds = array<i64: 4, 1>}, {pipeline_mode = #tpu.pipeline_mode<synchronous>, transform_indices = @transform_6, window_bounds = array<i64: 9, 4, 48>}, {pipeline_mode = #tpu.pipeline_mode<synchronous>, transform_indices = @transform_7, window_bounds = array<i64: 4, 1>}, {pipeline_mode = #tpu.pipeline_mode<synchronous>, transform_indices = @transform_8, window_bounds = array<i64: 4, 16>}, {pipeline_mode = #tpu.pipeline_mode<synchronous>, transform_indices = @transform_9, window_bounds = array<i64: 4, 1>}, {transform_indices = @transform_10, window_bounds = array<i64: 1, 4, 384>}]} {
    %cst = arith.constant 0.000000e+00 : bf16
    %0 = vector.broadcast %cst : bf16 to vector<12x640xbf16>
    %c4 = arith.constant 4 : index
    %c0 = arith.constant 0 : index
    %1 = vector.load %arg12[%c4, %c0] : memref<48x640xbf16, #tpu.memory_space<vmem>>, vector<12x640xbf16>
    tpu.vector_store %arg12[%c4, %c0], %0 {strides = array<i32>} : memref<48x640xbf16, #tpu.memory_space<vmem>>, vector<12x640xbf16>,
    %cst_0 = arith.constant 0.000000e+00 : bf16
    %2 = vector.broadcast %cst_0 : bf16 to vector<12x640xbf16>
    %c20 = arith.constant 20 : index
    %c0_1 = arith.constant 0 : index
    %3 = vector.load %arg12[%c20, %c0_1] : memref<48x640xbf16, #tpu.memory_space<vmem>>, vector<12x640xbf16>
    tpu.vector_store %arg12[%c20, %c0_1], %2 {strides = array<i32>} : memref<48x640xbf16, #tpu.memory_space<vmem>>, vector<12x640xbf16>,
    %cst_2 = arith.constant 0.000000e+00 : bf16
    %4 = vector.broadcast %cst_2 : bf16 to vector<12x640xbf16>
    %c36 = arith.constant 36 : index
    %c0_3 = arith.constant 0 : index
    %5 = vector.load %arg12[%c36, %c0_3] : memref<48x640xbf16, #tpu.memory_space<vmem>>, vector<12x640xbf16>
    tpu.vector_store %arg12[%c36, %c0_3], %4 {strides = array<i32>} : memref<48x640xbf16, #tpu.memory_space<vmem>>, vector<12x640xbf16>,
    %c0_4 = arith.constant 0 : index
    %c0_5 = arith.constant 0 : index
    %6 = vector.load %arg2[%c0_4, %c0_5] : memref<1x384xf32, #tpu.memory_space<vmem>>, vector<1x384xf32>
    %cst_6 = arith.constant 5.000000e-01 : f32
    %7 = vector.broadcast %cst_6 : f32 to vector<1x384xf32>
    %8 = arith.cmpf ogt, %6, %7 : vector<1x384xf32>
    %c0_7 = arith.constant 0 : index
    %c0_8 = arith.constant 0 : index
    %c0_9 = arith.constant 0 : index
    %9 = vector.load %arg1[%c0_7, %c0_8, %c0_9] : memref<1x4x384xf32, #tpu.memory_space<vmem>>, vector<1x4x384xf32>
    %10 = vector.shape_cast %9 : vector<1x4x384xf32> to vector<4x384xf32>
    %11 = arith.truncf %10 : vector<4x384xf32> to vector<4x384xbf16>
    %c0_10 = arith.constant 0 : index
    %c128 = arith.constant 128 : index
    %12 = vector.load %arg12[%c0_10, %c128] : memref<48x640xbf16, #tpu.memory_space<vmem>>, vector<4x384xbf16>
    tpu.vector_store %arg12[%c0_10, %c128], %11 {strides = array<i32>} : memref<48x640xbf16, #tpu.memory_space<vmem>>, vector<4x384xbf16>,
    %c0_11 = arith.constant 0 : index
    %c0_12 = arith.constant 0 : index
    %13 = vector.load %arg9[%c0_11, %c0_12] : memref<4x16xbf16, #tpu.memory_space<vmem>>, vector<4x4xbf16>
    %cst_13 = arith.constant dense<0.000000e+00> : vector<4x384xf32>
    %14 = tpu.matmul %13, %11, %cst_13 {dimension_numbers = #tpu.dot_dimension_numbers<[1], [0], [0], [1], [0, 0, 1, 1], [], []>} : vector<4x4xbf16>, vector<4x384xbf16>, vector<4x384xf32> -> vector<4x384xf32>
    %c0_14 = arith.constant 0 : index
    %c0_15 = arith.constant 0 : index
    %c0_16 = arith.constant 0 : index
    %15 = vector.load %arg3[%c0_14, %c0_15, %c0_16] : memref<9x4x16xbf16, #tpu.memory_space<vmem>>, vector<1x4x16xbf16>
    %16 = vector.shape_cast %15 : vector<1x4x16xbf16> to vector<4x16xbf16>
    %c0_17 = arith.constant 0 : index
    %c109 = arith.constant 109 : index
    %17 = vector.load %arg12[%c0_17, %c109] : memref<48x640xbf16, #tpu.memory_space<vmem>>, vector<16x384xbf16>
    %cst_18 = arith.constant dense<0.000000e+00> : vector<4x384xf32>
    %18 = tpu.matmul %16, %17, %cst_18 {dimension_numbers = #tpu.dot_dimension_numbers<[1], [0], [0], [1], [0, 0, 1, 1], [], []>} : vector<4x16xbf16>, vector<16x384xbf16>, vector<4x384xf32> -> vector<4x384xf32>
    %c1 = arith.constant 1 : index
    %c0_19 = arith.constant 0 : index
    %c0_20 = arith.constant 0 : index
    %19 = vector.load %arg3[%c1, %c0_19, %c0_20] : memref<9x4x16xbf16, #tpu.memory_space<vmem>>, vector<1x4x16xbf16>
    %20 = vector.shape_cast %19 : vector<1x4x16xbf16> to vector<4x16xbf16>
    %c0_21 = arith.constant 0 : index
    %c110 = arith.constant 110 : index
    %21 = vector.load %arg12[%c0_21, %c110] : memref<48x640xbf16, #tpu.memory_space<vmem>>, vector<16x384xbf16>
    %cst_22 = arith.constant dense<0.000000e+00> : vector<4x384xf32>
    %22 = tpu.matmul %20, %21, %cst_22 {dimension_numbers = #tpu.dot_dimension_numbers<[1], [0], [0], [1], [0, 0, 1, 1], [], []>} : vector<4x16xbf16>, vector<16x384xbf16>, vector<4x384xf32> -> vector<4x384xf32>
    %23 = arith.addf %18, %22 : vector<4x384xf32>
    %c2 = arith.constant 2 : index
    %c0_23 = arith.constant 0 : index
    %c0_24 = arith.constant 0 : index
    %24 = vector.load %arg3[%c2, %c0_23, %c0_24] : memref<9x4x16xbf16, #tpu.memory_space<vmem>>, vector<1x4x16xbf16>
    %25 = vector.shape_cast %24 : vector<1x4x16xbf16> to vector<4x16xbf16>
    %c0_25 = arith.constant 0 : index
    %c111 = arith.constant 111 : index
    %26 = vector.load %arg12[%c0_25, %c111] : memref<48x640xbf16, #tpu.memory_space<vmem>>, vector<16x384xbf16>
    %cst_26 = arith.constant dense<0.000000e+00> : vector<4x384xf32>
    %27 = tpu.matmul %25, %26, %cst_26 {dimension_numbers = #tpu.dot_dimension_numbers<[1], [0], [0], [1], [0, 0, 1, 1], [], []>} : vector<4x16xbf16>, vector<16x384xbf16>, vector<4x384xf32> -> vector<4x384xf32>
    %28 = arith.addf %23, %27 : vector<4x384xf32>
    %c3 = arith.constant 3 : index
    %c0_27 = arith.constant 0 : index
    %c0_28 = arith.constant 0 : index
    %29 = vector.load %arg3[%c3, %c0_27, %c0_28] : memref<9x4x16xbf16, #tpu.memory_space<vmem>>, vector<1x4x16xbf16>
    %30 = vector.shape_cast %29 : vector<1x4x16xbf16> to vector<4x16xbf16>
    %c0_29 = arith.constant 0 : index
    %c127 = arith.constant 127 : index
    %31 = vector.load %arg12[%c0_29, %c127] : memref<48x640xbf16, #tpu.memory_space<vmem>>, vector<16x384xbf16>
    %cst_30 = arith.constant dense<0.000000e+00> : vector<4x384xf32>
    %32 = tpu.matmul %30, %31, %cst_30 {dimension_numbers = #tpu.dot_dimension_numbers<[1], [0], [0], [1], [0, 0, 1, 1], [], []>} : vector<4x16xbf16>, vector<16x384xbf16>, vector<4x384xf32> -> vector<4x384xf32>
    %33 = arith.addf %28, %32 : vector<4x384xf32>
    %c4_31 = arith.constant 4 : index
    %c0_32 = arith.constant 0 : index
    %c0_33 = arith.constant 0 : index
    %34 = vector.load %arg3[%c4_31, %c0_32, %c0_33] : memref<9x4x16xbf16, #tpu.memory_space<vmem>>, vector<1x4x16xbf16>
    %35 = vector.shape_cast %34 : vector<1x4x16xbf16> to vector<4x16xbf16>
    %c0_34 = arith.constant 0 : index
    %c128_35 = arith.constant 128 : index
    %36 = vector.load %arg12[%c0_34, %c128_35] : memref<48x640xbf16, #tpu.memory_space<vmem>>, vector<16x384xbf16>
    %cst_36 = arith.constant dense<0.000000e+00> : vector<4x384xf32>
    %37 = tpu.matmul %35, %36, %cst_36 {dimension_numbers = #tpu.dot_dimension_numbers<[1], [0], [0], [1], [0, 0, 1, 1], [], []>} : vector<4x16xbf16>, vector<16x384xbf16>, vector<4x384xf32> -> vector<4x384xf32>
    %38 = arith.addf %33, %37 : vector<4x384xf32>
    %c5 = arith.constant 5 : index
    %c0_37 = arith.constant 0 : index
    %c0_38 = arith.constant 0 : index
    %39 = vector.load %arg3[%c5, %c0_37, %c0_38] : memref<9x4x16xbf16, #tpu.memory_space<vmem>>, vector<1x4x16xbf16>
    %40 = vector.shape_cast %39 : vector<1x4x16xbf16> to vector<4x16xbf16>
    %c0_39 = arith.constant 0 : index
    %c129 = arith.constant 129 : index
    %41 = vector.load %arg12[%c0_39, %c129] : memref<48x640xbf16, #tpu.memory_space<vmem>>, vector<16x384xbf16>
    %cst_40 = arith.constant dense<0.000000e+00> : vector<4x384xf32>
    %42 = tpu.matmul %40, %41, %cst_40 {dimension_numbers = #tpu.dot_dimension_numbers<[1], [0], [0], [1], [0, 0, 1, 1], [], []>} : vector<4x16xbf16>, vector<16x384xbf16>, vector<4x384xf32> -> vector<4x384xf32>
    %43 = arith.addf %38, %42 : vector<4x384xf32>
    %c6 = arith.constant 6 : index
    %c0_41 = arith.constant 0 : index
    %c0_42 = arith.constant 0 : index
    %44 = vector.load %arg3[%c6, %c0_41, %c0_42] : memref<9x4x16xbf16, #tpu.memory_space<vmem>>, vector<1x4x16xbf16>
    %45 = vector.shape_cast %44 : vector<1x4x16xbf16> to vector<4x16xbf16>
    %c0_43 = arith.constant 0 : index
    %c145 = arith.constant 145 : index
    %46 = vector.load %arg12[%c0_43, %c145] : memref<48x640xbf16, #tpu.memory_space<vmem>>, vector<16x384xbf16>
    %cst_44 = arith.constant dense<0.000000e+00> : vector<4x384xf32>
    %47 = tpu.matmul %45, %46, %cst_44 {dimension_numbers = #tpu.dot_dimension_numbers<[1], [0], [0], [1], [0, 0, 1, 1], [], []>} : vector<4x16xbf16>, vector<16x384xbf16>, vector<4x384xf32> -> vector<4x384xf32>
    %48 = arith.addf %43, %47 : vector<4x384xf32>
    %c7 = arith.constant 7 : index
    %c0_45 = arith.constant 0 : index
    %c0_46 = arith.constant 0 : index
    %49 = vector.load %arg3[%c7, %c0_45, %c0_46] : memref<9x4x16xbf16, #tpu.memory_space<vmem>>, vector<1x4x16xbf16>
    %50 = vector.shape_cast %49 : vector<1x4x16xbf16> to vector<4x16xbf16>
    %c0_47 = arith.constant 0 : index
    %c146 = arith.constant 146 : index
    %51 = vector.load %arg12[%c0_47, %c146] : memref<48x640xbf16, #tpu.memory_space<vmem>>, vector<16x384xbf16>
    %cst_48 = arith.constant dense<0.000000e+00> : vector<4x384xf32>
    %52 = tpu.matmul %50, %51, %cst_48 {dimension_numbers = #tpu.dot_dimension_numbers<[1], [0], [0], [1], [0, 0, 1, 1], [], []>} : vector<4x16xbf16>, vector<16x384xbf16>, vector<4x384xf32> -> vector<4x384xf32>
    %53 = arith.addf %48, %52 : vector<4x384xf32>
    %c8 = arith.constant 8 : index
    %c0_49 = arith.constant 0 : index
    %c0_50 = arith.constant 0 : index
    %54 = vector.load %arg3[%c8, %c0_49, %c0_50] : memref<9x4x16xbf16, #tpu.memory_space<vmem>>, vector<1x4x16xbf16>
    %55 = vector.shape_cast %54 : vector<1x4x16xbf16> to vector<4x16xbf16>
    %c0_51 = arith.constant 0 : index
    %c147 = arith.constant 147 : index
    %56 = vector.load %arg12[%c0_51, %c147] : memref<48x640xbf16, #tpu.memory_space<vmem>>, vector<16x384xbf16>
    %cst_52 = arith.constant dense<0.000000e+00> : vector<4x384xf32>
    %57 = tpu.matmul %55, %56, %cst_52 {dimension_numbers = #tpu.dot_dimension_numbers<[1], [0], [0], [1], [0, 0, 1, 1], [], []>} : vector<4x16xbf16>, vector<16x384xbf16>, vector<4x384xf32> -> vector<4x384xf32>
    %58 = arith.addf %53, %57 : vector<4x384xf32>
    %c0_53 = arith.constant 0 : index
    %c0_54 = arith.constant 0 : index
    %59 = vector.load %arg4[%c0_53, %c0_54] : memref<4x1xf32, #tpu.memory_space<vmem>>, vector<4x1xf32>
    %60 = vector.broadcast %59 : vector<4x1xf32> to vector<4x384xf32>
    %61 = arith.addf %58, %60 : vector<4x384xf32>
    %cst_55 = arith.constant 0.000000e+00 : f32
    %62 = vector.broadcast %cst_55 : f32 to vector<4x384xf32>
    %63 = arith.maximumf %61, %62 : vector<4x384xf32>
    %cst_56 = arith.constant 0.000000e+00 : f32
    %64 = vector.shape_cast %8 : vector<1x384xi1> to vector<1x384xi1>
    %65 = vector.broadcast %64 : vector<1x384xi1> to vector<4x384xi1>
    %66 = vector.broadcast %cst_56 : f32 to vector<4x384xf32>
    %67 = arith.select %65, %63, %66 : vector<4x384xi1>, vector<4x384xf32>
    %68 = arith.truncf %67 : vector<4x384xf32> to vector<4x384xbf16>
    %c16 = arith.constant 16 : index
    %c128_57 = arith.constant 128 : index
    %69 = vector.load %arg12[%c16, %c128_57] : memref<48x640xbf16, #tpu.memory_space<vmem>>, vector<4x384xbf16>
    tpu.vector_store %arg12[%c16, %c128_57], %68 {strides = array<i32>} : memref<48x640xbf16, #tpu.memory_space<vmem>>, vector<4x384xbf16>,
    %c0_58 = arith.constant 0 : index
    %c4_59 = arith.constant 4 : index
    %70 = vector.load %arg9[%c0_58, %c4_59] : memref<4x16xbf16, #tpu.memory_space<vmem>>, vector<4x4xbf16>
    %cst_60 = arith.constant dense<0.000000e+00> : vector<4x384xf32>
    %71 = tpu.matmul %70, %68, %cst_60 {dimension_numbers = #tpu.dot_dimension_numbers<[1], [0], [0], [1], [0, 0, 1, 1], [], []>} : vector<4x4xbf16>, vector<4x384xbf16>, vector<4x384xf32> -> vector<4x384xf32>
    %72 = arith.addf %14, %71 : vector<4x384xf32>
    %c0_61 = arith.constant 0 : index
    %c0_62 = arith.constant 0 : index
    %c0_63 = arith.constant 0 : index
    %73 = vector.load %arg5[%c0_61, %c0_62, %c0_63] : memref<9x4x32xbf16, #tpu.memory_space<vmem>>, vector<1x4x32xbf16>
    %74 = vector.shape_cast %73 : vector<1x4x32xbf16> to vector<4x32xbf16>
    %c0_64 = arith.constant 0 : index
    %c109_65 = arith.constant 109 : index
    %75 = vector.load %arg12[%c0_64, %c109_65] : memref<48x640xbf16, #tpu.memory_space<vmem>>, vector<32x384xbf16>
    %cst_66 = arith.constant dense<0.000000e+00> : vector<4x384xf32>
    %76 = tpu.matmul %74, %75, %cst_66 {dimension_numbers = #tpu.dot_dimension_numbers<[1], [0], [0], [1], [0, 0, 1, 1], [], []>} : vector<4x32xbf16>, vector<32x384xbf16>, vector<4x384xf32> -> vector<4x384xf32>
    %c1_67 = arith.constant 1 : index
    %c0_68 = arith.constant 0 : index
    %c0_69 = arith.constant 0 : index
    %77 = vector.load %arg5[%c1_67, %c0_68, %c0_69] : memref<9x4x32xbf16, #tpu.memory_space<vmem>>, vector<1x4x32xbf16>
    %78 = vector.shape_cast %77 : vector<1x4x32xbf16> to vector<4x32xbf16>
    %c0_70 = arith.constant 0 : index
    %c110_71 = arith.constant 110 : index
    %79 = vector.load %arg12[%c0_70, %c110_71] : memref<48x640xbf16, #tpu.memory_space<vmem>>, vector<32x384xbf16>
    %cst_72 = arith.constant dense<0.000000e+00> : vector<4x384xf32>
    %80 = tpu.matmul %78, %79, %cst_72 {dimension_numbers = #tpu.dot_dimension_numbers<[1], [0], [0], [1], [0, 0, 1, 1], [], []>} : vector<4x32xbf16>, vector<32x384xbf16>, vector<4x384xf32> -> vector<4x384xf32>
    %81 = arith.addf %76, %80 : vector<4x384xf32>
    %c2_73 = arith.constant 2 : index
    %c0_74 = arith.constant 0 : index
    %c0_75 = arith.constant 0 : index
    %82 = vector.load %arg5[%c2_73, %c0_74, %c0_75] : memref<9x4x32xbf16, #tpu.memory_space<vmem>>, vector<1x4x32xbf16>
    %83 = vector.shape_cast %82 : vector<1x4x32xbf16> to vector<4x32xbf16>
    %c0_76 = arith.constant 0 : index
    %c111_77 = arith.constant 111 : index
    %84 = vector.load %arg12[%c0_76, %c111_77] : memref<48x640xbf16, #tpu.memory_space<vmem>>, vector<32x384xbf16>
    %cst_78 = arith.constant dense<0.000000e+00> : vector<4x384xf32>
    %85 = tpu.matmul %83, %84, %cst_78 {dimension_numbers = #tpu.dot_dimension_numbers<[1], [0], [0], [1], [0, 0, 1, 1], [], []>} : vector<4x32xbf16>, vector<32x384xbf16>, vector<4x384xf32> -> vector<4x384xf32>
    %86 = arith.addf %81, %85 : vector<4x384xf32>
    %c3_79 = arith.constant 3 : index
    %c0_80 = arith.constant 0 : index
    %c0_81 = arith.constant 0 : index
    %87 = vector.load %arg5[%c3_79, %c0_80, %c0_81] : memref<9x4x32xbf16, #tpu.memory_space<vmem>>, vector<1x4x32xbf16>
    %88 = vector.shape_cast %87 : vector<1x4x32xbf16> to vector<4x32xbf16>
    %c0_82 = arith.constant 0 : index
    %c127_83 = arith.constant 127 : index
    %89 = vector.load %arg12[%c0_82, %c127_83] : memref<48x640xbf16, #tpu.memory_space<vmem>>, vector<32x384xbf16>
    %cst_84 = arith.constant dense<0.000000e+00> : vector<4x384xf32>
    %90 = tpu.matmul %88, %89, %cst_84 {dimension_numbers = #tpu.dot_dimension_numbers<[1], [0], [0], [1], [0, 0, 1, 1], [], []>} : vector<4x32xbf16>, vector<32x384xbf16>, vector<4x384xf32> -> vector<4x384xf32>
    %91 = arith.addf %86, %90 : vector<4x384xf32>
    %c4_85 = arith.constant 4 : index
    %c0_86 = arith.constant 0 : index
    %c0_87 = arith.constant 0 : index
    %92 = vector.load %arg5[%c4_85, %c0_86, %c0_87] : memref<9x4x32xbf16, #tpu.memory_space<vmem>>, vector<1x4x32xbf16>
    %93 = vector.shape_cast %92 : vector<1x4x32xbf16> to vector<4x32xbf16>
    %c0_88 = arith.constant 0 : index
    %c128_89 = arith.constant 128 : index
    %94 = vector.load %arg12[%c0_88, %c128_89] : memref<48x640xbf16, #tpu.memory_space<vmem>>, vector<32x384xbf16>
    %cst_90 = arith.constant dense<0.000000e+00> : vector<4x384xf32>
    %95 = tpu.matmul %93, %94, %cst_90 {dimension_numbers = #tpu.dot_dimension_numbers<[1], [0], [0], [1], [0, 0, 1, 1], [], []>} : vector<4x32xbf16>, vector<32x384xbf16>, vector<4x384xf32> -> vector<4x384xf32>
    %96 = arith.addf %91, %95 : vector<4x384xf32>
    %c5_91 = arith.constant 5 : index
    %c0_92 = arith.constant 0 : index
    %c0_93 = arith.constant 0 : index
    %97 = vector.load %arg5[%c5_91, %c0_92, %c0_93] : memref<9x4x32xbf16, #tpu.memory_space<vmem>>, vector<1x4x32xbf16>
    %98 = vector.shape_cast %97 : vector<1x4x32xbf16> to vector<4x32xbf16>
    %c0_94 = arith.constant 0 : index
    %c129_95 = arith.constant 129 : index
    %99 = vector.load %arg12[%c0_94, %c129_95] : memref<48x640xbf16, #tpu.memory_space<vmem>>, vector<32x384xbf16>
    %cst_96 = arith.constant dense<0.000000e+00> : vector<4x384xf32>
    %100 = tpu.matmul %98, %99, %cst_96 {dimension_numbers = #tpu.dot_dimension_numbers<[1], [0], [0], [1], [0, 0, 1, 1], [], []>} : vector<4x32xbf16>, vector<32x384xbf16>, vector<4x384xf32> -> vector<4x384xf32>
    %101 = arith.addf %96, %100 : vector<4x384xf32>
    %c6_97 = arith.constant 6 : index
    %c0_98 = arith.constant 0 : index
    %c0_99 = arith.constant 0 : index
    %102 = vector.load %arg5[%c6_97, %c0_98, %c0_99] : memref<9x4x32xbf16, #tpu.memory_space<vmem>>, vector<1x4x32xbf16>
    %103 = vector.shape_cast %102 : vector<1x4x32xbf16> to vector<4x32xbf16>
    %c0_100 = arith.constant 0 : index
    %c145_101 = arith.constant 145 : index
    %104 = vector.load %arg12[%c0_100, %c145_101] : memref<48x640xbf16, #tpu.memory_space<vmem>>, vector<32x384xbf16>
    %cst_102 = arith.constant dense<0.000000e+00> : vector<4x384xf32>
    %105 = tpu.matmul %103, %104, %cst_102 {dimension_numbers = #tpu.dot_dimension_numbers<[1], [0], [0], [1], [0, 0, 1, 1], [], []>} : vector<4x32xbf16>, vector<32x384xbf16>, vector<4x384xf32> -> vector<4x384xf32>
    %106 = arith.addf %101, %105 : vector<4x384xf32>
    %c7_103 = arith.constant 7 : index
    %c0_104 = arith.constant 0 : index
    %c0_105 = arith.constant 0 : index
    %107 = vector.load %arg5[%c7_103, %c0_104, %c0_105] : memref<9x4x32xbf16, #tpu.memory_space<vmem>>, vector<1x4x32xbf16>
    %108 = vector.shape_cast %107 : vector<1x4x32xbf16> to vector<4x32xbf16>
    %c0_106 = arith.constant 0 : index
    %c146_107 = arith.constant 146 : index
    %109 = vector.load %arg12[%c0_106, %c146_107] : memref<48x640xbf16, #tpu.memory_space<vmem>>, vector<32x384xbf16>
    %cst_108 = arith.constant dense<0.000000e+00> : vector<4x384xf32>
    %110 = tpu.matmul %108, %109, %cst_108 {dimension_numbers = #tpu.dot_dimension_numbers<[1], [0], [0], [1], [0, 0, 1, 1], [], []>} : vector<4x32xbf16>, vector<32x384xbf16>, vector<4x384xf32> -> vector<4x384xf32>
    %111 = arith.addf %106, %110 : vector<4x384xf32>
    %c8_109 = arith.constant 8 : index
    %c0_110 = arith.constant 0 : index
    %c0_111 = arith.constant 0 : index
    %112 = vector.load %arg5[%c8_109, %c0_110, %c0_111] : memref<9x4x32xbf16, #tpu.memory_space<vmem>>, vector<1x4x32xbf16>
    %113 = vector.shape_cast %112 : vector<1x4x32xbf16> to vector<4x32xbf16>
    %c0_112 = arith.constant 0 : index
    %c147_113 = arith.constant 147 : index
    %114 = vector.load %arg12[%c0_112, %c147_113] : memref<48x640xbf16, #tpu.memory_space<vmem>>, vector<32x384xbf16>
    %cst_114 = arith.constant dense<0.000000e+00> : vector<4x384xf32>
    %115 = tpu.matmul %113, %114, %cst_114 {dimension_numbers = #tpu.dot_dimension_numbers<[1], [0], [0], [1], [0, 0, 1, 1], [], []>} : vector<4x32xbf16>, vector<32x384xbf16>, vector<4x384xf32> -> vector<4x384xf32>
    %116 = arith.addf %111, %115 : vector<4x384xf32>
    %c0_115 = arith.constant 0 : index
    %c0_116 = arith.constant 0 : index
    %117 = vector.load %arg6[%c0_115, %c0_116] : memref<4x1xf32, #tpu.memory_space<vmem>>, vector<4x1xf32>
    %118 = vector.broadcast %117 : vector<4x1xf32> to vector<4x384xf32>
    %119 = arith.addf %116, %118 : vector<4x384xf32>
    %cst_117 = arith.constant 0.000000e+00 : f32
    %120 = vector.broadcast %cst_117 : f32 to vector<4x384xf32>
    %121 = arith.maximumf %119, %120 : vector<4x384xf32>
    %cst_118 = arith.constant 0.000000e+00 : f32
    %122 = vector.shape_cast %8 : vector<1x384xi1> to vector<1x384xi1>
    %123 = vector.broadcast %122 : vector<1x384xi1> to vector<4x384xi1>
    %124 = vector.broadcast %cst_118 : f32 to vector<4x384xf32>
    %125 = arith.select %123, %121, %124 : vector<4x384xi1>, vector<4x384xf32>
    %126 = arith.truncf %125 : vector<4x384xf32> to vector<4x384xbf16>
    %c32 = arith.constant 32 : index
    %c128_119 = arith.constant 128 : index
    %127 = vector.load %arg12[%c32, %c128_119] : memref<48x640xbf16, #tpu.memory_space<vmem>>, vector<4x384xbf16>
    tpu.vector_store %arg12[%c32, %c128_119], %126 {strides = array<i32>} : memref<48x640xbf16, #tpu.memory_space<vmem>>, vector<4x384xbf16>,
    %c0_120 = arith.constant 0 : index
    %c8_121 = arith.constant 8 : index
    %128 = vector.load %arg9[%c0_120, %c8_121] : memref<4x16xbf16, #tpu.memory_space<vmem>>, vector<4x4xbf16>
    %cst_122 = arith.constant dense<0.000000e+00> : vector<4x384xf32>
    %129 = tpu.matmul %128, %126, %cst_122 {dimension_numbers = #tpu.dot_dimension_numbers<[1], [0], [0], [1], [0, 0, 1, 1], [], []>} : vector<4x4xbf16>, vector<4x384xbf16>, vector<4x384xf32> -> vector<4x384xf32>
    %130 = arith.addf %72, %129 : vector<4x384xf32>
    %c0_123 = arith.constant 0 : index
    %c0_124 = arith.constant 0 : index
    %c0_125 = arith.constant 0 : index
    %131 = vector.load %arg7[%c0_123, %c0_124, %c0_125] : memref<9x4x48xbf16, #tpu.memory_space<vmem>>, vector<1x4x48xbf16>
    %132 = vector.shape_cast %131 : vector<1x4x48xbf16> to vector<4x48xbf16>
    %c0_126 = arith.constant 0 : index
    %c109_127 = arith.constant 109 : index
    %133 = vector.load %arg12[%c0_126, %c109_127] : memref<48x640xbf16, #tpu.memory_space<vmem>>, vector<48x384xbf16>
    %cst_128 = arith.constant dense<0.000000e+00> : vector<4x384xf32>
    %134 = tpu.matmul %132, %133, %cst_128 {dimension_numbers = #tpu.dot_dimension_numbers<[1], [0], [0], [1], [0, 0, 1, 1], [], []>} : vector<4x48xbf16>, vector<48x384xbf16>, vector<4x384xf32> -> vector<4x384xf32>
    %c1_129 = arith.constant 1 : index
    %c0_130 = arith.constant 0 : index
    %c0_131 = arith.constant 0 : index
    %135 = vector.load %arg7[%c1_129, %c0_130, %c0_131] : memref<9x4x48xbf16, #tpu.memory_space<vmem>>, vector<1x4x48xbf16>
    %136 = vector.shape_cast %135 : vector<1x4x48xbf16> to vector<4x48xbf16>
    %c0_132 = arith.constant 0 : index
    %c110_133 = arith.constant 110 : index
    %137 = vector.load %arg12[%c0_132, %c110_133] : memref<48x640xbf16, #tpu.memory_space<vmem>>, vector<48x384xbf16>
    %cst_134 = arith.constant dense<0.000000e+00> : vector<4x384xf32>
    %138 = tpu.matmul %136, %137, %cst_134 {dimension_numbers = #tpu.dot_dimension_numbers<[1], [0], [0], [1], [0, 0, 1, 1], [], []>} : vector<4x48xbf16>, vector<48x384xbf16>, vector<4x384xf32> -> vector<4x384xf32>
    %139 = arith.addf %134, %138 : vector<4x384xf32>
    %c2_135 = arith.constant 2 : index
    %c0_136 = arith.constant 0 : index
    %c0_137 = arith.constant 0 : index
    %140 = vector.load %arg7[%c2_135, %c0_136, %c0_137] : memref<9x4x48xbf16, #tpu.memory_space<vmem>>, vector<1x4x48xbf16>
    %141 = vector.shape_cast %140 : vector<1x4x48xbf16> to vector<4x48xbf16>
    %c0_138 = arith.constant 0 : index
    %c111_139 = arith.constant 111 : index
    %142 = vector.load %arg12[%c0_138, %c111_139] : memref<48x640xbf16, #tpu.memory_space<vmem>>, vector<48x384xbf16>
    %cst_140 = arith.constant dense<0.000000e+00> : vector<4x384xf32>
    %143 = tpu.matmul %141, %142, %cst_140 {dimension_numbers = #tpu.dot_dimension_numbers<[1], [0], [0], [1], [0, 0, 1, 1], [], []>} : vector<4x48xbf16>, vector<48x384xbf16>, vector<4x384xf32> -> vector<4x384xf32>
    %144 = arith.addf %139, %143 : vector<4x384xf32>
    %c3_141 = arith.constant 3 : index
    %c0_142 = arith.constant 0 : index
    %c0_143 = arith.constant 0 : index
    %145 = vector.load %arg7[%c3_141, %c0_142, %c0_143] : memref<9x4x48xbf16, #tpu.memory_space<vmem>>, vector<1x4x48xbf16>
    %146 = vector.shape_cast %145 : vector<1x4x48xbf16> to vector<4x48xbf16>
    %c0_144 = arith.constant 0 : index
    %c127_145 = arith.constant 127 : index
    %147 = vector.load %arg12[%c0_144, %c127_145] : memref<48x640xbf16, #tpu.memory_space<vmem>>, vector<48x384xbf16>
    %cst_146 = arith.constant dense<0.000000e+00> : vector<4x384xf32>
    %148 = tpu.matmul %146, %147, %cst_146 {dimension_numbers = #tpu.dot_dimension_numbers<[1], [0], [0], [1], [0, 0, 1, 1], [], []>} : vector<4x48xbf16>, vector<48x384xbf16>, vector<4x384xf32> -> vector<4x384xf32>
    %149 = arith.addf %144, %148 : vector<4x384xf32>
    %c4_147 = arith.constant 4 : index
    %c0_148 = arith.constant 0 : index
    %c0_149 = arith.constant 0 : index
    %150 = vector.load %arg7[%c4_147, %c0_148, %c0_149] : memref<9x4x48xbf16, #tpu.memory_space<vmem>>, vector<1x4x48xbf16>
    %151 = vector.shape_cast %150 : vector<1x4x48xbf16> to vector<4x48xbf16>
    %c0_150 = arith.constant 0 : index
    %c128_151 = arith.constant 128 : index
    %152 = vector.load %arg12[%c0_150, %c128_151] : memref<48x640xbf16, #tpu.memory_space<vmem>>, vector<48x384xbf16>
    %cst_152 = arith.constant dense<0.000000e+00> : vector<4x384xf32>
    %153 = tpu.matmul %151, %152, %cst_152 {dimension_numbers = #tpu.dot_dimension_numbers<[1], [0], [0], [1], [0, 0, 1, 1], [], []>} : vector<4x48xbf16>, vector<48x384xbf16>, vector<4x384xf32> -> vector<4x384xf32>
    %154 = arith.addf %149, %153 : vector<4x384xf32>
    %c5_153 = arith.constant 5 : index
    %c0_154 = arith.constant 0 : index
    %c0_155 = arith.constant 0 : index
    %155 = vector.load %arg7[%c5_153, %c0_154, %c0_155] : memref<9x4x48xbf16, #tpu.memory_space<vmem>>, vector<1x4x48xbf16>
    %156 = vector.shape_cast %155 : vector<1x4x48xbf16> to vector<4x48xbf16>
    %c0_156 = arith.constant 0 : index
    %c129_157 = arith.constant 129 : index
    %157 = vector.load %arg12[%c0_156, %c129_157] : memref<48x640xbf16, #tpu.memory_space<vmem>>, vector<48x384xbf16>
    %cst_158 = arith.constant dense<0.000000e+00> : vector<4x384xf32>
    %158 = tpu.matmul %156, %157, %cst_158 {dimension_numbers = #tpu.dot_dimension_numbers<[1], [0], [0], [1], [0, 0, 1, 1], [], []>} : vector<4x48xbf16>, vector<48x384xbf16>, vector<4x384xf32> -> vector<4x384xf32>
    %159 = arith.addf %154, %158 : vector<4x384xf32>
    %c6_159 = arith.constant 6 : index
    %c0_160 = arith.constant 0 : index
    %c0_161 = arith.constant 0 : index
    %160 = vector.load %arg7[%c6_159, %c0_160, %c0_161] : memref<9x4x48xbf16, #tpu.memory_space<vmem>>, vector<1x4x48xbf16>
    %161 = vector.shape_cast %160 : vector<1x4x48xbf16> to vector<4x48xbf16>
    %c0_162 = arith.constant 0 : index
    %c145_163 = arith.constant 145 : index
    %162 = vector.load %arg12[%c0_162, %c145_163] : memref<48x640xbf16, #tpu.memory_space<vmem>>, vector<48x384xbf16>
    %cst_164 = arith.constant dense<0.000000e+00> : vector<4x384xf32>
    %163 = tpu.matmul %161, %162, %cst_164 {dimension_numbers = #tpu.dot_dimension_numbers<[1], [0], [0], [1], [0, 0, 1, 1], [], []>} : vector<4x48xbf16>, vector<48x384xbf16>, vector<4x384xf32> -> vector<4x384xf32>
    %164 = arith.addf %159, %163 : vector<4x384xf32>
    %c7_165 = arith.constant 7 : index
    %c0_166 = arith.constant 0 : index
    %c0_167 = arith.constant 0 : index
    %165 = vector.load %arg7[%c7_165, %c0_166, %c0_167] : memref<9x4x48xbf16, #tpu.memory_space<vmem>>, vector<1x4x48xbf16>
    %166 = vector.shape_cast %165 : vector<1x4x48xbf16> to vector<4x48xbf16>
    %c0_168 = arith.constant 0 : index
    %c146_169 = arith.constant 146 : index
    %167 = vector.load %arg12[%c0_168, %c146_169] : memref<48x640xbf16, #tpu.memory_space<vmem>>, vector<48x384xbf16>
    %cst_170 = arith.constant dense<0.000000e+00> : vector<4x384xf32>
    %168 = tpu.matmul %166, %167, %cst_170 {dimension_numbers = #tpu.dot_dimension_numbers<[1], [0], [0], [1], [0, 0, 1, 1], [], []>} : vector<4x48xbf16>, vector<48x384xbf16>, vector<4x384xf32> -> vector<4x384xf32>
    %169 = arith.addf %164, %168 : vector<4x384xf32>
    %c8_171 = arith.constant 8 : index
    %c0_172 = arith.constant 0 : index
    %c0_173 = arith.constant 0 : index
    %170 = vector.load %arg7[%c8_171, %c0_172, %c0_173] : memref<9x4x48xbf16, #tpu.memory_space<vmem>>, vector<1x4x48xbf16>
    %171 = vector.shape_cast %170 : vector<1x4x48xbf16> to vector<4x48xbf16>
    %c0_174 = arith.constant 0 : index
    %c147_175 = arith.constant 147 : index
    %172 = vector.load %arg12[%c0_174, %c147_175] : memref<48x640xbf16, #tpu.memory_space<vmem>>, vector<48x384xbf16>
    %cst_176 = arith.constant dense<0.000000e+00> : vector<4x384xf32>
    %173 = tpu.matmul %171, %172, %cst_176 {dimension_numbers = #tpu.dot_dimension_numbers<[1], [0], [0], [1], [0, 0, 1, 1], [], []>} : vector<4x48xbf16>, vector<48x384xbf16>, vector<4x384xf32> -> vector<4x384xf32>
    %174 = arith.addf %169, %173 : vector<4x384xf32>
    %c0_177 = arith.constant 0 : index
    %c0_178 = arith.constant 0 : index
    %175 = vector.load %arg8[%c0_177, %c0_178] : memref<4x1xf32, #tpu.memory_space<vmem>>, vector<4x1xf32>
    %176 = vector.broadcast %175 : vector<4x1xf32> to vector<4x384xf32>
    %177 = arith.addf %174, %176 : vector<4x384xf32>
    %cst_179 = arith.constant 0.000000e+00 : f32
    %178 = vector.broadcast %cst_179 : f32 to vector<4x384xf32>
    %179 = arith.maximumf %177, %178 : vector<4x384xf32>
    %cst_180 = arith.constant 0.000000e+00 : f32
    %180 = vector.shape_cast %8 : vector<1x384xi1> to vector<1x384xi1>
    %181 = vector.broadcast %180 : vector<1x384xi1> to vector<4x384xi1>
    %182 = vector.broadcast %cst_180 : f32 to vector<4x384xf32>
    %183 = arith.select %181, %179, %182 : vector<4x384xi1>, vector<4x384xf32>
    %184 = arith.truncf %183 : vector<4x384xf32> to vector<4x384xbf16>
    %c0_181 = arith.constant 0 : index
    %c12 = arith.constant 12 : index
    %185 = vector.load %arg9[%c0_181, %c12] : memref<4x16xbf16, #tpu.memory_space<vmem>>, vector<4x4xbf16>
    %cst_182 = arith.constant dense<0.000000e+00> : vector<4x384xf32>
    %186 = tpu.matmul %185, %184, %cst_182 {dimension_numbers = #tpu.dot_dimension_numbers<[1], [0], [0], [1], [0, 0, 1, 1], [], []>} : vector<4x4xbf16>, vector<4x384xbf16>, vector<4x384xf32> -> vector<4x384xf32>
    %187 = arith.addf %130, %186 : vector<4x384xf32>
    %c0_183 = arith.constant 0 : index
    %c0_184 = arith.constant 0 : index
    %188 = vector.load %arg10[%c0_183, %c0_184] : memref<4x1xf32, #tpu.memory_space<vmem>>, vector<4x1xf32>
    %189 = vector.broadcast %188 : vector<4x1xf32> to vector<4x384xf32>
    %190 = arith.addf %187, %189 : vector<4x384xf32>
    %191 = arith.addf %190, %10 : vector<4x384xf32>
    %c0_185 = arith.constant 0 : index
    %c0_186 = arith.constant 0 : index
    %c0_187 = arith.constant 0 : index
    %192 = vector.load %arg11[%c0_185, %c0_186, %c0_187] : memref<1x4x384xf32, #tpu.memory_space<vmem>>, vector<1x4x384xf32>
    %193 = vector.shape_cast %192 : vector<1x4x384xf32> to vector<4x384xf32>
    %194 = vector.shape_cast %191 : vector<4x384xf32> to vector<1x4x384xf32>
    tpu.vector_store %arg11[%c0_185, %c0_186, %c0_187], %194 {strides = array<i32>} : memref<1x4x384xf32, #tpu.memory_space<vmem>>, vector<1x4x384xf32>,
    return
  }
  func.func @transform_0(%arg0: i32) -> (i32, i32, i32) {
    %c0_i32 = arith.constant 0 : i32
    %c0_i32_0 = arith.constant 0 : i32
    %c0_i32_1 = arith.constant 0 : i32
    return %arg0, %c0_i32, %c0_i32_0 : i32, i32, i32
  }
  func.func @transform_1(%arg0: i32) -> (i32, i32) {
    %c0_i32 = arith.constant 0 : i32
    %c0_i32_0 = arith.constant 0 : i32
    %c0_i32_1 = arith.constant 0 : i32
    return %c0_i32, %c0_i32_0 : i32, i32
  }
  func.func @transform_2(%arg0: i32) -> (i32, i32, i32) {
    %c0_i32 = arith.constant 0 : i32
    %c0_i32_0 = arith.constant 0 : i32
    %c0_i32_1 = arith.constant 0 : i32
    %c0_i32_2 = arith.constant 0 : i32
    return %c0_i32, %c0_i32_0, %c0_i32_1 : i32, i32, i32
  }
  func.func @transform_3(%arg0: i32) -> (i32, i32) {
    %c0_i32 = arith.constant 0 : i32
    %c0_i32_0 = arith.constant 0 : i32
    %c0_i32_1 = arith.constant 0 : i32
    return %c0_i32, %c0_i32_0 : i32, i32
  }
  func.func @transform_4(%arg0: i32) -> (i32, i32, i32) {
    %c0_i32 = arith.constant 0 : i32
    %c0_i32_0 = arith.constant 0 : i32
    %c0_i32_1 = arith.constant 0 : i32
    %c0_i32_2 = arith.constant 0 : i32
    return %c0_i32, %c0_i32_0, %c0_i32_1 : i32, i32, i32
  }
  func.func @transform_5(%arg0: i32) -> (i32, i32) {
    %c0_i32 = arith.constant 0 : i32
    %c0_i32_0 = arith.constant 0 : i32
    %c0_i32_1 = arith.constant 0 : i32
    return %c0_i32, %c0_i32_0 : i32, i32
  }
  func.func @transform_6(%arg0: i32) -> (i32, i32, i32) {
    %c0_i32 = arith.constant 0 : i32
    %c0_i32_0 = arith.constant 0 : i32
    %c0_i32_1 = arith.constant 0 : i32
    %c0_i32_2 = arith.constant 0 : i32
    return %c0_i32, %c0_i32_0, %c0_i32_1 : i32, i32, i32
  }
  func.func @transform_7(%arg0: i32) -> (i32, i32) {
    %c0_i32 = arith.constant 0 : i32
    %c0_i32_0 = arith.constant 0 : i32
    %c0_i32_1 = arith.constant 0 : i32
    return %c0_i32, %c0_i32_0 : i32, i32
  }
  func.func @transform_8(%arg0: i32) -> (i32, i32) {
    %c0_i32 = arith.constant 0 : i32
    %c0_i32_0 = arith.constant 0 : i32
    %c0_i32_1 = arith.constant 0 : i32
    return %c0_i32, %c0_i32_0 : i32, i32
  }
  func.func @transform_9(%arg0: i32) -> (i32, i32) {
    %c0_i32 = arith.constant 0 : i32
    %c0_i32_0 = arith.constant 0 : i32
    %c0_i32_1 = arith.constant 0 : i32
    return %c0_i32, %c0_i32_0 : i32, i32
  }
  func.func @transform_10(%arg0: i32) -> (i32, i32, i32) {
    %c0_i32 = arith.constant 0 : i32
    %c0_i32_0 = arith.constant 0 : i32
    %c0_i32_1 = arith.constant 0 : i32
    return %arg0, %c0_i32, %c0_i32_0 : i32, i32, i32
  }
}

</mosaic_0001>

<bundles_post_ra>
// kernel: rdb_forward_nchw.1
= control target key start
LH: loop header
LB: loop body
LE: loop exit
PB: predicated region body
PF: predicated region fallthrough
CT: control target
= control target key end

     0   :  { %s4659_s13 = smov 0   ;;  %s5984_s0 = inlined_call_operand.vmem [shape: f32[2,4,384], index: 0, kind: input, shape index: {}]   ;;  %s5985_s1 = inlined_call_operand.vmem [shape: f32[1,384], index: 1, kind: input, shape index: {}]   ;;  %s5986_s2 = inlined_call_operand.vmem [shape: bf16[9,4,16], index: 2, kind: input, shape index: {}]   ;;  %s5987_s3 = inlined_call_operand.vmem [shape: f32[4,1], index: 3, kind: input, shape index: {}]   ;;  %s5988_s4 = inlined_call_operand.vmem [shape: bf16[9,4,32], index: 4, kind: input, shape index: {}]   ;;  %s5989_s5 = inlined_call_operand.vmem [shape: f32[4,1], index: 5, kind: input, shape index: {}]   ;;  %s5990_s6 = inlined_call_operand.vmem [shape: bf16[9,4,48], index: 6, kind: input, shape index: {}]   ;;  %s5991_s7 = inlined_call_operand.vmem [shape: f32[4,1], index: 7, kind: input, shape index: {}]   ;;  %s5992_s8 = inlined_call_operand.vmem [shape: bf16[4,16], index: 8, kind: input, shape index: {}]   ;;  %s5993_s9 = inlined_call_operand.vmem [shape: f32[4,1], index: 9, kind: input, shape index: {}]   ;;  %s5994_s10 = inlined_call_operand.vmem [shape: f32[2,4,384], index: 10, kind: output, shape index: {}]  }
   0x1 LB: > { %s4113_s14 = sadd.s32 4294967295, %s4588_s13   ;;  %p4117_p0 = scmp.ge.s32.totalorder %s4588_s13, 1  ;;  %s4588_s13 = sphi %s4659_s13, %s20_s13  }
   0x2   : > { %p312_p1 = scmp.lt.s32.totalorder %s4588_s13, 3 }
   0x4   : > { %p313_p2 = pnand %p4117_p0, %p312_p1 }
   0x6   : > { %316 = sbr.rel (%p313_p2) target bundleno = 1561 (0x619), region = 60 }
   0xd   : > { %p4667_p3 = scmp.lt.s32.totalorder %s4113_s14, 1  ;;  %v5995_v0 = vmov 0   ;;  %s4591_s20 = smov 18   ;;  %v5997_v7 = vmov 0.0   ;;  %vm4593_vm0 = vmmov 0   ;;  %vm409_vm1 = vcmask 146432  }
   0xe   : > { %361 = vst [vmem:[#allocation2] sm:$0xfc] %v5995_v0  ;;  %362 = vst [vmem:[#allocation2 + $0x8] sm:$0xfc] %v5995_v0  ;;  %452 = vmatprep.mubr.bf16.mxu0 %v5995_v0  ;;  %4567 = vset.pattern.permute.xlu0 %v5995_v0  ;;  %s4594_s21 = smov 19   ;;  %s4595_s22 = smov 17  }
   0xf   : > { %363 = vst [vmem:[#allocation2 + $0x10] sm:$0xfc] %v5995_v0  ;;  %364 = vst [vmem:[#allocation2 + $0x18] sm:$0xfc] %v5995_v0  ;;  %s6006_s14 = smov (!%p4667_p3, %s4113_s14), 1  ;;  %4568 = vset.pattern.permute.xlu1 %v5995_v0  ;;  %4304 = vmatprep.subr.bf16.mxu1 %v5997_v7  ;;  %s4596_s23 = smov 1  }
  0x10   : > { %365 = vst [vmem:[#allocation2 + $0x20] sm:$0xfc] %v5995_v0  ;;  %366 = vst [vmem:[#allocation2 + $0x28] sm:$0xfc] %v5995_v0  ;;  %s4544_s16 = smul.u32 12, %s6006_s14  ;;  %4306 = vmatprep.mubr.msk.bf16.mxu1 %vm4593_vm0, %v5997_v7  ;;  %s4597_s24 = smov 127  }
  0x11   : > { %367 = vst [vmem:[#allocation2 + $0x30] sm:$0xfc] %v5995_v0  ;;  %368 = vst [vmem:[#allocation2 + $0x38] sm:$0xfc] %v5995_v0  ;;  %s4598_s25 = smov 111   ;;  %s4599_s26 = smov 110  }
  0x12   : > { %369 = vst [vmem:[#allocation2 + $0x40] sm:$0xfc] %v5995_v0  ;;  %370 = vst [vmem:[#allocation2 + $0x48] sm:$0xfc] %v5995_v0  ;;  %s4699_s19 = scalar_lea.vmem %s5984_s0, %s4544_s16  ;;  %s4600_s27 = smov 109   ;;  %vm416_vm2 = vcmask 130048  }
  0x13   : > { %371 = vst [vmem:[#allocation2 + $0x50] sm:$0xfc] %v5995_v0  ;;  %372 = vst [vmem:[#allocation2 + $0x58] sm:$0xfc] %v5995_v0  ;;  %v378_v1 = vld [vmem:[%s4699_s19] sm:$0xff]  ;;  %vm509_vm3 = vcmask 154624   ;;  %s359_s11 = scalar_lea.vmem %s5994_s10, %s4544_s16 }
  0x14   : > { %373 = vst [vmem:[#allocation2 + $0x60] sm:$0xfc] %v5995_v0  ;;  %374 = vst [vmem:[#allocation2 + $0x68] sm:$0xfc] %v5995_v0  ;;  %v379_v2 = vld [vmem:[%s4699_s19 + $0x8] sm:$0xf]  ;;  %v4705_v4 = vpack.c.bf16 %v378_v1, %v378_v1  ;;  %v4709_v6 = vcombine.high %v378_v1, %v378_v1 }
  0x15   : > { %375 = vst [vmem:[#allocation2 + $0x70] sm:$0xfc] %v5995_v0  ;;  %v4703_v3 = vld [vmem:[#allocation2] sm:$0xff]  ;;  %v4707_v5 = vpack.c.bf16 %v379_v2, %v379_v2  ;;  %vm610_vm4 = vcmask 138240   ;;  %vm714_vm5 = vcmask 7168   ;;  %vm915_vm6 = vcmask 1039360  }
  0x16   : > { %6001 = vst [vmem:[#allocation3_spill] sm:$0xff] %v4709_v6  ;;  %401 = vrot.lane.b32.xlu1 %v4703_v3, %s4591_s20  ;;  %386 = vst [vmem:[#allocation2 + $0x8] sm:$0x3] %v4705_v4  ;;  %v4718_v8 = vpack.c.bf16 %v4709_v6, %v4709_v6  ;;  %v1321_v13 = vld [vmem:[%s5987_s3] sm:$0xf]  ;;  %vm1019_vm7 = vcmask 908288  }
  0x17   : > { %388 = vst [vmem:[#allocation2 + $0x18] sm:$0x3] %v4707_v5  ;;  %v4765_v12 = vld [vmem:[#allocation2 + $0x20] sm:$0xff]  ;;  %v4131_v52 = vld [vmem:[%s5986_s2 + $0x8] sm:$0x3]  ;;  %vm1123_vm8 = vcmask 900096  }
  0x18   : > { %387 = vst [vmem:[#allocation2 + $0x10] sm:$0x3] %v4718_v8  ;;  %v4120_v22 = vld [vmem:[%s5986_s2 + $0x2] sm:$0x3]  ;;  %v390_v30 = vld [vmem:[%s5986_s2] sm:$0x3] }
  0x19   : > { %v4125_v38 = vld [vmem:[%s5986_s2 + $0x4] sm:$0x3]  ;;  %v4128_v46 = vld [vmem:[%s5986_s2 + $0x6] sm:$0x3]  ;;  %v4134_v60 = vld [vmem:[%s5986_s2 + $0xa] sm:$0x3] }
  0x1a   : > { %vm1227_vm9 = vcmask 891904   ;;  %s4601_s17 = smov 124   ;;  %vm1373_vm14 = vcmask 1041408   ;;  %vm1369_vm15 = vcmask 31744   ;;  %s4602_s15 = smov 120  }
  0x1b   : > { %s4603_s29 = smov 116  }
  0x1d   : > { %v4723_v9 = vld [vmem:[#allocation2 + $0x8] sm:$0xff] }
  0x1e   : > { %503 = vrot.lane.b32.xlu1 %v4723_v9, %s4594_s21  ;;  %403 = vrot.lane.b32.xlu0 %v4723_v9, %s4591_s20  ;;  %v4729_v10 = vld [vmem:[#allocation2 + $0x18] sm:$0xff] }
  0x1f   : > { %v4731_v11 = vld [vmem:[#allocation2 + $0x10] sm:$0xff] }
  0x22   : > { %407 = vrot.lane.b32.xlu1 %v4729_v10, %s4591_s20  ;;  %405 = vrot.lane.b32.xlu0 %v4731_v11, %s4591_s20 }
  0x26   : > { %604 = vrot.lane.b32.xlu1 %v4723_v9, %s4595_s22  ;;  %505 = vrot.lane.b32.xlu0 %v4731_v11, %s4594_s21 }
  0x2a   : > { %507 = vrot.lane.b32.xlu1 %v4729_v10, %s4594_s21  ;;  %501 = vrot.lane.b32.xlu0 %v4703_v3, %s4594_s21 }
  0x2e   : > { %708 = vrot.lane.b32.xlu1 %v4723_v9, %s4596_s23  ;;  %606 = vrot.lane.b32.xlu0 %v4731_v11, %s4595_s22 }
  0x32   : > { %608 = vrot.lane.b32.xlu1 %v4729_v10, %s4595_s22  ;;  %602 = vrot.lane.b32.xlu0 %v4703_v3, %s4595_s22 }
  0x36   : > { %712 = vrot.lane.b32.xlu1 %v4729_v10, %s4596_s23  ;;  %710 = vrot.lane.b32.xlu0 %v4731_v11, %s4596_s23 }
  0x3a   : > { %911 = vrot.lane.b32.xlu1 %v4729_v10, %s4597_s24  ;;  %706 = vrot.lane.b32.xlu0 %v4703_v3, %s4596_s23 }
  0x3e   : > { %1013 = vrot.lane.b32.xlu1 %v4731_v11, %s4598_s25  ;;  %909 = vrot.lane.b32.xlu0 %v4731_v11, %s4597_s24 }
  0x42   : > { %913 = vrot.lane.b32.xlu1 %v4765_v12, %s4597_s24  ;;  %907 = vrot.lane.b32.xlu0 %v4723_v9, %s4597_s24 }
  0x46   : > { %1015 = vrot.lane.b32.xlu0 %v4729_v10, %s4598_s25  ;;  %1117 = vrot.lane.b32.xlu1 %v4731_v11, %s4599_s26 }
  0x4a   : > { %1011 = vrot.lane.b32.xlu0 %v4723_v9, %s4598_s25  ;;  %1017 = vrot.lane.b32.xlu1 %v4765_v12, %s4598_s25 }
  0x4e   : > { %1119 = vrot.lane.b32.xlu0 %v4729_v10, %s4599_s26  ;;  %1221 = vrot.lane.b32.xlu1 %v4731_v11, %s4600_s27 }
  0x52   : > { %1115 = vrot.lane.b32.xlu0 %v4723_v9, %s4599_s26  ;;  %1121 = vrot.lane.b32.xlu1 %v4765_v12, %s4599_s26 }
  0x56   : > { %1223 = vrot.lane.b32.xlu0 %v4729_v10, %s4600_s27  ;;  %1225 = vrot.lane.b32.xlu1 %v4765_v12, %s4600_s27 }
  0x5a   : > { %1219 = vrot.lane.b32.xlu0 %v4723_v9, %s4600_s27 }
  0x5e   : > { %1324 = vperm.xlu0 %4567, %v1321_v13  }
  0x62   : > { %1580 = vrot.lane.b32.xlu0 %v4731_v11, %s4591_s20 }
  0x88   : > { %v402_v14 = vpop.permute.xlu1 %401 }
  0x90   : > { %v504_v15 = vpop.permute.xlu1 %503  ;;  %v404_v16 = vpop.permute.xlu0 %403 }
  0x91   : > { %v410_v21 = vsel %vm409_vm1, %v402_v14, %v404_v16 }
  0x94   : > { %v408_v17 = vpop.permute.xlu1 %407  ;;  %v406_v18 = vpop.permute.xlu0 %405 }
  0x95   : > { %v411_v19 = vsel %vm409_vm1, %v404_v16, %v406_v18  ;;  %v412_v20 = vsel %vm409_vm1, %v406_v18, %v408_v17 }
  0x96   : > { %420 = vmatprep.subr.bf16.mxu0 %v411_v19  ;;  %4305 = vmatpush3.bf16.msra.mxu1 %v412_v20 }
  0x97   : > { %421 = vmatpush1.bf16.msra.mxu0 %v410_v21  ;;  %4310 = vmatprep.subr.bf16.mxu1 %v5997_v7  ;;  %v4140_v21 = vld [vmem:[%s5986_s2 + $0xe] sm:$0x3] }
  0x98   : > { %v605_v23 = vpop.permute.xlu1 %604  ;;  %v506_v24 = vpop.permute.xlu0 %505 }
  0x99   : > { %4307 = vmatmul.mubr.msk.bf16.vlgmr.msra.gmra.mrb[0].mxu1 %vm416_vm2, %v4120_v22  ;;  %v511_v25 = vsel %vm509_vm3, %v504_v15, %v506_v24 }
  0x9a   : > { %4121 = vmatmul.mubr.msk.bf16.vlgmr.msra.gmra.mrb[0].mxu0 %vm416_vm2, %v4120_v22  ;;  %519 = vmatprep.subr.bf16.mxu0 %v511_v25  ;;  %v4143_v25 = vld [vmem:[%s5986_s2 + $0x10] sm:$0x3] }
  0x9b   : > { %4312 = vmatprep.mubr.msk.bf16.mxu1 %vm4593_vm0, %v5997_v7  ;;  %551 = vmatprep.mubr.bf16.mxu0 %v5995_v0 }
  0x9c   : > { %v508_v26 = vpop.permute.xlu1 %507  ;;  %v502_v27 = vpop.permute.xlu0 %501 }
  0x9d   : > { %v512_v28 = vsel %vm509_vm3, %v506_v24, %v508_v26  ;;  %v510_v29 = vsel %vm509_vm3, %v502_v27, %v504_v15  ;;  %v4137_v15 = vld [vmem:[%s5986_s2 + $0xc] sm:$0x3]  ;;  %v4909_v26 = vld.sshfl [vmem:[%s5992_s8] sm:$0x3 pattern:$0x76325410] }
  0x9e   : > { %520 = vmatpush1.bf16.msra.mxu0 %v510_v29  ;;  %4311 = vmatpush3.bf16.msra.mxu1 %v512_v28  ;;  %v4914_v27 = vld [vmem:[#allocation2 + $0x28] sm:$0xff] }
  0x9f   : > { %4316 = vmatprep.subr.bf16.mxu1 %v5997_v7  ;;  %1367 = vrot.lane.b32.xlu1 %v4909_v26, %s4601_s17 }
  0xa0   : > { %v709_v31 = vpop.permute.xlu1 %708  ;;  %v607_v32 = vpop.permute.xlu0 %606  ;;  %1584 = vrot.lane.b32.xlu0 %v4914_v27, %s4591_s20 }
  0xa1   : > { %4313 = vmatmul.mubr.msk.bf16.vlgmr.msra.gmra.mrb[4].mxu1 %vm416_vm2, %v390_v30  ;;  %v612_v33 = vsel %vm610_vm4, %v605_v23, %v607_v32 }
  0xa2   : > { %4123 = vmatmul.mubr.msk.bf16.vlgmr.msra.gmra.mrb[4].mxu0 %vm416_vm2, %v390_v30  ;;  %620 = vmatprep.subr.bf16.mxu0 %v612_v33 }
  0xa3   : > { %4318 = vmatprep.mubr.msk.bf16.mxu1 %vm4593_vm0, %v5997_v7  ;;  %652 = vmatprep.mubr.bf16.mxu0 %v5995_v0 }
  0xa4   : > { %v609_v34 = vpop.permute.xlu1 %608  ;;  %v603_v35 = vpop.permute.xlu0 %602  ;;  %1578 = vrot.lane.b32.xlu1 %v4723_v9, %s4591_s20  ;;  %1691 = vrot.lane.b32.xlu0 %v4723_v9, %s4594_s21 }
  0xa5   : > { %v613_v36 = vsel %vm610_vm4, %v607_v32, %v609_v34  ;;  %v611_v37 = vsel %vm610_vm4, %v603_v35, %v605_v23 }
  0xa6   : > { %621 = vmatpush1.bf16.msra.mxu0 %v611_v37  ;;  %4317 = vmatpush3.bf16.msra.mxu1 %v613_v36 }
  0xa7   : > { %4322 = vmatprep.subr.bf16.mxu1 %v5997_v7 }
  0xa8   : > { %v713_v39 = vpop.permute.xlu1 %712  ;;  %v711_v40 = vpop.permute.xlu0 %710  ;;  %1576 = vrot.lane.b32.xlu1 %v4703_v3, %s4591_s20  ;;  %1689 = vrot.lane.b32.xlu0 %v4703_v3, %s4594_s21 }
  0xa9   : > { %4319 = vmatmul.mubr.msk.bf16.vlgmr.msra.gmra.mrb[8].mxu1 %vm416_vm2, %v4125_v38  ;;  %v716_v41 = vsel %vm714_vm5, %v709_v31, %v711_v40  ;;  %v717_v42 = vsel %vm714_vm5, %v711_v40, %v713_v39 }
  0xaa   : > { %4126 = vmatmul.mubr.msk.bf16.vlgmr.msra.gmra.mrb[8].mxu0 %vm416_vm2, %v4125_v38  ;;  %724 = vmatprep.subr.bf16.mxu0 %v716_v41 }
  0xab   : > { %4323 = vmatpush3.bf16.msra.mxu1 %v717_v42  ;;  %4324 = vmatprep.mubr.msk.bf16.mxu1 %vm4593_vm0, %v5997_v7 }
  0xac   : > { %v912_v43 = vpop.permute.xlu1 %911  ;;  %v707_v44 = vpop.permute.xlu0 %706  ;;  %756 = vmatprep.mubr.bf16.mxu0 %v5995_v0  ;;  %4328 = vmatprep.subr.bf16.mxu1 %v5997_v7 }
  0xad   : > { %v715_v45 = vsel %vm714_vm5, %v707_v44, %v709_v31  ;;  %1582 = vrot.lane.b32.xlu1 %v4729_v10, %s4591_s20  ;;  %1697 = vrot.lane.b32.xlu0 %v4914_v27, %s4594_s21 }
  0xae   : > { %725 = vmatpush1.bf16.msra.mxu0 %v715_v45 }
  0xaf   : > { %813 = vmatprep.subr.bf16.mxu0 %v4731_v11 }
  0xb0   : > { %v1014_v47 = vpop.permute.xlu1 %1013  ;;  %v910_v48 = vpop.permute.xlu0 %909 }
  0xb1   : > { %4325 = vmatmul.mubr.msk.bf16.vlgmr.msra.gmra.mrb[12].mxu1 %vm416_vm2, %v4128_v46  ;;  %v917_v49 = vsel %vm915_vm6, %v910_v48, %v912_v43  ;;  %1693 = vrot.lane.b32.xlu1 %v4731_v11, %s4594_s21 }
  0xb2   : > { %4129 = vmatmul.mubr.msk.bf16.vlgmr.msra.gmra.mrb[12].mxu0 %vm416_vm2, %v4128_v46  ;;  %4329 = vmatpush3.bf16.msra.mxu1 %v4729_v10 }
  0xb3   : > { %814 = vmatpush1.bf16.msra.mxu0 %v4723_v9  ;;  %4330 = vmatprep.mubr.msk.bf16.mxu1 %vm4593_vm0, %v5997_v7 }
  0xb4   : > { %v914_v50 = vpop.permute.xlu1 %913  ;;  %v908_v51 = vpop.permute.xlu0 %907  ;;  %925 = vmatprep.subr.bf16.mxu0 %v917_v49  ;;  %4334 = vmatprep.subr.bf16.mxu1 %v5997_v7 }
  0xb5   : > { %845 = vmatprep.mubr.bf16.mxu0 %v5995_v0  ;;  %v916_v53 = vsel %vm915_vm6, %v908_v51, %v910_v48  ;;  %v918_v56 = vsel %vm915_vm6, %v912_v43, %v914_v50  ;;  %1695 = vrot.lane.b32.xlu1 %v4729_v10, %s4594_s21 }
  0xb6   : > { %1805 = vrot.lane.b32.xlu0 %v4723_v9, %s4595_s22 }
  0xb8   : > { %v1016_v54 = vpop.permute.xlu0 %1015  ;;  %v1118_v55 = vpop.permute.xlu1 %1117 }
  0xb9   : > { %4331 = vmatmul.mubr.msk.bf16.vlgmr.msra.gmra.mrb[16].mxu1 %vm416_vm2, %v4131_v52  ;;  %v1021_v57 = vsel %vm1019_vm7, %v1014_v47, %v1016_v54  ;;  %1807 = vrot.lane.b32.xlu1 %v4731_v11, %s4595_s22 }
  0xba   : > { %4335 = vmatpush3.bf16.msra.mxu1 %v918_v56  ;;  %4132 = vmatmul.mubr.msk.bf16.vlgmr.msra.gmra.mrb[16].mxu0 %vm416_vm2, %v4131_v52 }
  0xbb   : > { %926 = vmatpush1.bf16.msra.mxu0 %v916_v53  ;;  %4336 = vmatprep.mubr.msk.bf16.mxu1 %vm4593_vm0, %v5997_v7 }
  0xbc   : > { %1029 = vmatprep.subr.bf16.mxu0 %v1021_v57  ;;  %v1012_v58 = vpop.permute.xlu0 %1011  ;;  %957 = vmatprep.mubr.bf16.mxu0 %v5995_v0  ;;  %v1018_v59 = vpop.permute.xlu1 %1017 }
  0xbd   : > { %4340 = vmatprep.subr.bf16.mxu1 %v5997_v7  ;;  %v1022_v61 = vsel %vm1019_vm7, %v1016_v54, %v1018_v59  ;;  %v1020_v2 = vsel %vm1019_vm7, %v1012_v58, %v1014_v47  ;;  %1809 = vrot.lane.b32.xlu1 %v4729_v10, %s4595_s22 }
  0xbe   : > { %1803 = vrot.lane.b32.xlu0 %v4703_v3, %s4595_s22 }
  0xc0   : > { %v1120_v62 = vpop.permute.xlu0 %1119  ;;  %v1222_v63 = vpop.permute.xlu1 %1221 }
  0xc1   : > { %4337 = vmatmul.mubr.msk.bf16.vlgmr.msra.gmra.mrb[20].mxu1 %vm416_vm2, %v4134_v60  ;;  %v1125_v1 = vsel %vm1123_vm8, %v1118_v55, %v1120_v62  ;;  %1924 = vrot.lane.b32.xlu1 %v4731_v11, %s4596_s23 }
  0xc2   : > { %4135 = vmatmul.mubr.msk.bf16.vlgmr.msra.gmra.mrb[20].mxu0 %vm416_vm2, %v4134_v60  ;;  %4341 = vmatpush3.bf16.msra.mxu1 %v1022_v61 }
  0xc3   : > { %1030 = vmatpush1.bf16.msra.mxu0 %v1020_v2  ;;  %4342 = vmatprep.mubr.msk.bf16.mxu1 %vm4593_vm0, %v5997_v7 }
  0xc4   : > { %1133 = vmatprep.subr.bf16.mxu0 %v1125_v1  ;;  %v1116_v13 = vpop.permute.xlu0 %1115  ;;  %1061 = vmatprep.mubr.bf16.mxu0 %v5995_v0  ;;  %v1122_v14 = vpop.permute.xlu1 %1121 }
  0xc5   : > { %4346 = vmatprep.subr.bf16.mxu1 %v5997_v7  ;;  %v1126_v16 = vsel %vm1123_vm8, %v1120_v62, %v1122_v14  ;;  %v1124_v19 = vsel %vm1123_vm8, %v1116_v13, %v1118_v55  ;;  %1811 = vrot.lane.b32.xlu0 %v4914_v27, %s4595_s22 }
  0xc6   : > { %1926 = vrot.lane.b32.xlu1 %v4729_v10, %s4596_s23 }
  0xc8   : > { %v1224_v17 = vpop.permute.xlu0 %1223  ;;  %v1226_v20 = vpop.permute.xlu1 %1225 }
  0xc9   : > { %4343 = vmatmul.mubr.msk.bf16.vlgmr.msra.gmra.mrb[24].mxu1 %vm416_vm2, %v4137_v15  ;;  %v1229_v18 = vsel %vm1227_vm9, %v1222_v63, %v1224_v17  ;;  %v1230_v23 = vsel %vm1227_vm9, %v1224_v17, %v1226_v20  ;;  %1922 = vrot.lane.b32.xlu0 %v4723_v9, %s4596_s23 }
  0xca   : > { %4138 = vmatmul.mubr.msk.bf16.vlgmr.msra.gmra.mrb[24].mxu0 %vm416_vm2, %v4137_v15  ;;  %4347 = vmatpush3.bf16.msra.mxu1 %v1126_v16 }
  0xcb   : > { %1134 = vmatpush1.bf16.msra.mxu0 %v1124_v19  ;;  %4348 = vmatprep.mubr.msk.bf16.mxu1 %vm4593_vm0, %v5997_v7 }
  0xcc   : > { %1237 = vmatprep.subr.bf16.mxu0 %v1229_v18  ;;  %1165 = vmatprep.mubr.bf16.mxu0 %v5995_v0  ;;  %v1220_v22 = vpop.permute.xlu0 %1219 }
  0xcd   : > { %4352 = vmatprep.subr.bf16.mxu1 %v5997_v7  ;;  %v1228_v24 = vsel %vm1227_vm9, %v1220_v22, %v1222_v63  ;;  %2144 = vrot.lane.b32.xlu1 %v4731_v11, %s4597_s24 }
  0xce   : > { %1920 = vrot.lane.b32.xlu0 %v4703_v3, %s4596_s23 }
  0xd1   : > { %4349 = vmatmul.mubr.msk.bf16.vlgmr.msra.gmra.mrb[28].mxu1 %vm416_vm2, %v4140_v21  ;;  %2142 = vrot.lane.b32.xlu1 %v4723_v9, %s4597_s24 }
  0xd2   : > { %4141 = vmatmul.mubr.msk.bf16.vlgmr.msra.gmra.mrb[28].mxu0 %vm416_vm2, %v4140_v21  ;;  %4353 = vmatpush3.bf16.msra.mxu1 %v1230_v23 }
  0xd3   : > { %1238 = vmatpush1.bf16.msra.mxu0 %v1228_v24  ;;  %4354 = vmatprep.mubr.msk.bf16.mxu1 %vm4593_vm0, %v5997_v7 }
  0xd4   : > { %1269 = vmatprep.mubr.bf16.mxu0 %v5995_v0  ;;  %4358 = vmatprep.subr.bf16.mxu1 %v5997_v7 }
  0xd5   : > { %1928 = vrot.lane.b32.xlu0 %v4914_v27, %s4596_s23 }
  0xd9   : > { %4355 = vmatmul.mubr.msk.bf16.vlgmr.msra.gmra.mrb[32].mxu1 %vm416_vm2, %v4143_v25  ;;  %2146 = vrot.lane.b32.xlu0 %v4729_v10, %s4597_s24 }
  0xda   : > { %4144 = vmatmul.mubr.msk.bf16.vlgmr.msra.gmra.mrb[32].mxu0 %vm416_vm2, %v4143_v25  ;;  %4360 = vmatprep.mubr.msk.bf16.mxu1 %vm4593_vm0, %v5997_v7  ;;  %vm1604_vm2 = vcmask 261120  }
  0xdb   : > { %1415 = vmatprep.mubr.bf16.mxu0 %v5995_v0 }
 0x16c   : > { %v495_v28 = vpop.f32.mrb[0].mxu1 }
 0x16d   : > { %v4308_v29 = vpop.f32.mrb[1].mxu1  ;;  %v454_v30 = vpop.f32.mrb[0].mxu0 }
 0x16e   : > { %v498_v31 = vpop.f32.mrb[2].mxu1  ;;  %v456_v32 = vpop.f32.mrb[1].mxu0 }
 0x16f   : > { %v4309_v33 = vpop.f32.mrb[3].mxu1  ;;  %v458_v34 = vpop.f32.mrb[2].mxu0 }
 0x170   : > { %v459_v35 = vpop.f32.mrb[3].mxu0 }
 0x174   : > { %v594_v36 = vpop.f32.mrb[4].mxu1 }
 0x175   : > { %v595_v37 = vadd.f32 %v594_v36, %v495_v28  ;;  %v4314_v38 = vpop.f32.mrb[5].mxu1  ;;  %v553_v39 = vpop.f32.mrb[4].mxu0 }
 0x176   : > { %v554_v40 = vadd.f32 %v553_v39, %v454_v30  ;;  %v597_v41 = vpop.f32.mrb[6].mxu1  ;;  %v555_v42 = vpop.f32.mrb[5].mxu0 }
 0x177   : > { %v556_v43 = vadd.f32 %v555_v42, %v456_v32  ;;  %v4315_v44 = vpop.f32.mrb[7].mxu1  ;;  %v557_v45 = vpop.f32.mrb[6].mxu0 }
 0x178   : > { %v558_v46 = vpop.f32.mrb[7].mxu0 }
 0x17c   : > { %v695_v47 = vpop.f32.mrb[8].mxu1 }
 0x17d   : > { %v703_v48 = vadd.f32 %v695_v47, %v595_v37  ;;  %v654_v49 = vpop.f32.mrb[8].mxu0  ;;  %v4320_v50 = vpop.f32.mrb[9].mxu1 }
 0x17e   : > { %v701_v51 = vadd.f32 %v654_v49, %v554_v40  ;;  %v656_v52 = vpop.f32.mrb[9].mxu0  ;;  %v698_v53 = vpop.f32.mrb[10].mxu1 }
 0x17f   : > { %v702_v54 = vadd.f32 %v656_v52, %v556_v43  ;;  %v4321_v55 = vpop.f32.mrb[11].mxu1  ;;  %v658_v56 = vpop.f32.mrb[10].mxu0  ;;  %v376_v52 = vld [vmem:[%s5985_s1] sm:$0x7] }
 0x180   : > { %v659_v57 = vpop.f32.mrb[11].mxu0  ;;  %vm377_vm10 = vcmp.gt.f32.partialorder %v376_v52, 0.5 }
 0x184   : > { %v799_v58 = vpop.f32.mrb[12].mxu1 }
 0x185   : > { %v807_v59 = vadd.f32 %v799_v58, %v703_v48  ;;  %v758_v60 = vpop.f32.mrb[12].mxu0  ;;  %v4326_v61 = vpop.f32.mrb[13].mxu1 }
 0x186   : > { %v805_v62 = vadd.f32 %v758_v60, %v701_v51  ;;  %v760_v63 = vpop.f32.mrb[13].mxu0  ;;  %v802_v1 = vpop.f32.mrb[14].mxu1  ;;  %v1334_v51 = vlaneseq }
 0x187   : > { %v806_v2 = vadd.f32 %v760_v63, %v702_v54  ;;  %v4327_v13 = vpop.f32.mrb[15].mxu1  ;;  %v762_v14 = vpop.f32.mrb[14].mxu0 }
 0x188   : > { %v763_v15 = vpop.f32.mrb[15].mxu0  ;;  %v1335_v54 = vshrl.u32 %v1334_v51, 7  ;;  %v1333_v13 = vsel %vm377_vm10, 1, %v5995_v0  ;;  %v1468_v51 = vsel %vm1373_vm14, %v4705_v4, 0  ;;  %vm2805_vm10 = vcmask 392192  }
 0x18a   : > { %v1336_v14 = vsub.s32 0, %v1335_v54  ;;  %v1340_v15 = vsub.s32 1, %v1335_v54 }
 0x18c   : > { %v888_v16 = vpop.f32.mrb[16].mxu1 }
 0x18d   : > { %v896_v17 = vadd.f32 %v888_v16, %v807_v59  ;;  %v847_v18 = vpop.f32.mrb[16].mxu0  ;;  %v4332_v19 = vpop.f32.mrb[17].mxu1 }
 0x18e   : > { %v894_v20 = vadd.f32 %v847_v18, %v805_v62  ;;  %v849_v21 = vpop.f32.mrb[17].mxu0  ;;  %v891_v22 = vpop.f32.mrb[18].mxu1 }
 0x18f   : > { %v895_v23 = vadd.f32 %v849_v21, %v806_v2  ;;  %v4333_v24 = vpop.f32.mrb[19].mxu1  ;;  %v851_v25 = vpop.f32.mrb[18].mxu0  ;;  %v1344_v2 = vsub.s32 2, %v1335_v54 }
 0x190   : > { %v852_v28 = vpop.f32.mrb[19].mxu0  ;;  %v1325_v16 = vpop.permute.xlu0 %1324 }
 0x191   : > { %v4962_v18 = vrot.slane %v1333_v13, %v1344_v2  ;;  %v1368_v19 = vpop.permute.xlu1 %1367 }
 0x193   : > { %vm1348_vm11 = vcmp.eq.s32.totalorder %v4962_v18, 1 }
 0x194   : > { %v1000_v29 = vpop.f32.mrb[20].mxu1  ;;  %v1581_v52 = vpop.permute.xlu0 %1580 }
 0x195   : > { %v1008_v30 = vadd.f32 %v1000_v29, %v896_v17  ;;  %v959_v31 = vpop.f32.mrb[20].mxu0  ;;  %v4338_v32 = vpop.f32.mrb[21].mxu1  ;;  %v4966_v29 = vrot.slane %v1333_v13, %v1340_v15  ;;  %v2608_v15 = vld [vmem:[%s5989_s5] sm:$0xf] }
 0x196   : > { %v1006_v33 = vadd.f32 %v959_v31, %v894_v20  ;;  %v961_v34 = vpop.f32.mrb[21].mxu0  ;;  %v1003_v35 = vpop.f32.mrb[22].mxu1 }
 0x197   : > { %v1007_v36 = vadd.f32 %v961_v34, %v895_v23  ;;  %v4339_v37 = vpop.f32.mrb[23].mxu1  ;;  %v963_v38 = vpop.f32.mrb[22].mxu0  ;;  %v4964_v23 = vrot.slane %v1333_v13, %v1336_v14  ;;  %vm1347_vm13 = vcmp.eq.s32.totalorder %v4966_v29, 1 }
 0x198   : > { %v964_v39 = vpop.f32.mrb[23].mxu0 }
 0x199   : > { %vm1346_vm12 = vcmp.eq.s32.totalorder %v4964_v23, 1  ;;  %v1579_v39 = vpop.permute.xlu1 %1578 }
 0x19c   : > { %v1104_v40 = vpop.f32.mrb[24].mxu1 }
 0x19d   : > { %v1112_v41 = vadd.f32 %v1104_v40, %v1008_v30  ;;  %v1063_v42 = vpop.f32.mrb[24].mxu0  ;;  %v4344_v43 = vpop.f32.mrb[25].mxu1 }
 0x19e   : > { %v1110_v44 = vadd.f32 %v1063_v42, %v1006_v33  ;;  %v1065_v45 = vpop.f32.mrb[25].mxu0  ;;  %v1107_v46 = vpop.f32.mrb[26].mxu1 }
 0x19f   : > { %v1111_v47 = vadd.f32 %v1065_v45, %v1007_v36  ;;  %v4345_v48 = vpop.f32.mrb[27].mxu1  ;;  %v1067_v49 = vpop.f32.mrb[26].mxu0 }
 0x1a0   : > { %v1068_v50 = vpop.f32.mrb[27].mxu0  ;;  %v1474_v49 = vsel %vm1373_vm14, %v4707_v5, 0 }
 0x1a1   : > { %v1577_v50 = vpop.permute.xlu1 %1576 }
 0x1a4   : > { %v1208_v53 = vpop.f32.mrb[28].mxu1 }
 0x1a5   : > { %v1216_v55 = vadd.f32 %v1208_v53, %v1112_v41  ;;  %v1167_v56 = vpop.f32.mrb[28].mxu0  ;;  %v4350_v57 = vpop.f32.mrb[29].mxu1  ;;  %v1593_v53 = vsel %vm409_vm1, %v1579_v39, %v1581_v52 }
 0x1a6   : > { %v1214_v58 = vadd.f32 %v1167_v56, %v1110_v44  ;;  %v1169_v59 = vpop.f32.mrb[29].mxu0  ;;  %v1211_v60 = vpop.f32.mrb[30].mxu1  ;;  %v1592_v56 = vsel %vm409_vm1, %v1577_v50, %v1579_v39 }
 0x1a7   : > { %v1215_v61 = vadd.f32 %v1169_v59, %v1111_v47  ;;  %v4351_v62 = vpop.f32.mrb[31].mxu1  ;;  %v1171_v63 = vpop.f32.mrb[30].mxu0 }
 0x1a8   : > { %v1172_v1 = vpop.f32.mrb[31].mxu0  ;;  %v1583_v4 = vpop.permute.xlu1 %1582 }
 0x1a9   : > { %v5062_v59 = vpop.permute.xlu0 %1584 }
 0x1ac   : > { %v1312_v17 = vpop.f32.mrb[32].mxu1  ;;  %v5087_v62 = vpop.permute.xlu1 %1693 }
 0x1ad   : > { %v1320_v20 = vadd.f32 %v1312_v17, %v1216_v55  ;;  %v1271_v21 = vpop.f32.mrb[32].mxu0  ;;  %v4356_v22 = vpop.f32.mrb[33].mxu1  ;;  %v1594_v55 = vsel %vm409_vm1, %v1581_v52, %v1583_v4  ;;  %v4570_v52 = vld [vmem:[#allocation2] sm:$0xff]  ;;  %v4571_v4 = vld [vmem:[#allocation2 + $0x18] sm:$0xff] }
 0x1ae   : > { %v1318_v24 = vadd.f32 %v1271_v21, %v1214_v58  ;;  %v1273_v25 = vpop.f32.mrb[33].mxu0  ;;  %v1315_v28 = vpop.f32.mrb[34].mxu1  ;;  %v2133_v58 = vld [vmem:[#allocation2 + $0x48] sm:$0xff] }
 0x1af   : > { %v1319_v30 = vadd.f32 %v1273_v25, %v1215_v61  ;;  %v1329_v31 = vadd.f32 %v1325_v16, %v1320_v20  ;;  %v4357_v32 = vpop.f32.mrb[35].mxu1  ;;  %v1275_v33 = vpop.f32.mrb[34].mxu0  ;;  %v5133_v20 = vld [vmem:[#allocation2 + $0x50] sm:$0xff] }
 0x1b0   : > { %v1327_v34 = vadd.f32 %v1325_v16, %v1318_v24  ;;  %v1276_v35 = vpop.f32.mrb[35].mxu0  ;;  %v5071_v60 = vpop.permute.xlu0 %1691 }
 0x1b1   : > { %v1328_v36 = vadd.f32 %v1325_v16, %v1319_v30  ;;  %v1332_v37 = vmax.f32 %v1329_v31, 0.0  ;;  %v5094_v1 = vpop.permute.xlu1 %1695 }
 0x1b2   : > { %v1330_v38 = vmax.f32 %v1327_v34, 0.0 }
 0x1b3   : > { %v1331_v40 = vmax.f32 %v1328_v36, 0.0  ;;  %v1351_v41 = vsel %vm1348_vm11, %v1332_v37, 0.0 }
 0x1b4   : > { %v1354_v42 = vpack.c.bf16 %v1351_v41, %v1351_v41  ;;  %v1349_v43 = vsel %vm1346_vm12, %v1330_v38, 0.0  ;;  %v5077_v61 = vpop.permute.xlu0 %1689  ;;  %v1706_v41 = vsel %vm509_vm3, %v5071_v60, %v5087_v62 }
 0x1b5   : > { %v1350_v44 = vsel %vm1347_vm13, %v1331_v40, 0.0  ;;  %v1352_v45 = vpack.c.bf16 %v1349_v43, %v1349_v43  ;;  %v5105_v13 = vpop.permute.xlu1 %1807  ;;  %v1705_v43 = vsel %vm509_vm3, %v5077_v61, %v5071_v60 }
 0x1b6   : > { %1357 = vst [vmem:[#allocation2 + $0x40] sm:$0x3] %v1354_v42  ;;  %v1381_v46 = vsel %vm1373_vm14, %v1354_v42, 0  ;;  %v1353_v47 = vpack.c.bf16 %v1350_v44, %v1350_v44  ;;  %v1707_v44 = vsel %vm509_vm3, %v5087_v62, %v5094_v1 }
 0x1b7   : > { %4359 = vmatpush3.bf16.msra.mxu1 %v1381_v46  ;;  %1355 = vst [vmem:[#allocation2 + $0x30] sm:$0x3] %v1352_v45  ;;  %v1375_v48 = vsel %vm1373_vm14, %v1352_v45, 0 }
 0x1b8   : > { %1356 = vst [vmem:[#allocation2 + $0x38] sm:$0x3] %v1353_v47  ;;  %4147 = vmatprep.subr.msk.bf16.mxu0 %vm1373_vm14, %v1353_v47  ;;  %4364 = vmatprep.subr.bf16.mxu1 %v5997_v7  ;;  %v5089_v63 = vpop.permute.xlu0 %1697 }
 0x1b9   : > { %1384 = vmatpush1.bf16.msra.mxu0 %v1375_v48  ;;  %v5114_v16 = vpop.permute.xlu1 %1809 }
 0x1ba   : > { %4361 = vmatmul.mubr.msk.bf16.vlgmr.msra.gmra.mrb[36].mxu1 %vm1369_vm15, %v1368_v19  ;;  %4150 = vmatprep.subr.msk.bf16.mxu0 %vm1373_vm14, %v4718_v8  ;;  %v389_v8 = vld [vmem:[%s5992_s8] sm:$0x3] }
 0x1bb   : > { %4365 = vmatpush3.bf16.msra.mxu1 %v1474_v49  ;;  %4366 = vmatprep.mubr.msk.bf16.mxu1 %vm4593_vm0, %v5997_v7 }
 0x1bc   : > { %4148 = vmatmul.mubr.msk.bf16.vlgmr.msra.gmra.mrb[36].mxu0 %vm1369_vm15, %v1368_v19  ;;  %4370 = vmatprep.subr.bf16.mxu1 %v5997_v7  ;;  %v5096_v2 = vpop.permute.xlu0 %1805 }
 0x1bd   : > { %v4993_v5 = vld [vmem:[#allocation2 + $0x40] sm:$0xff]  ;;  %1477 = vmatpush1.bf16.msra.mxu0 %v1468_v51  ;;  %1508 = vmatprep.mubr.bf16.mxu0 %v5995_v0  ;;  %v1820_v50 = vsel %vm610_vm4, %v5096_v2, %v5105_v13 }
 0x1be   : > { %1934 = vrot.lane.b32.xlu0 %v4993_v5, %s4596_s23  ;;  %1590 = vrot.lane.b32.xlu1 %v4993_v5, %s4591_s20  ;;  %v5003_v54 = vld [vmem:[#allocation2 + $0x30] sm:$0xff] }
 0x1bf   : > { %1608 = vmatprep.subr.bf16.mxu0 %v1593_v53  ;;  %v5021_v57 = vld [vmem:[#allocation2 + $0x38] sm:$0xff]  ;;  %v1821_v53 = vsel %vm610_vm4, %v5105_v13, %v5114_v16 }
 0x1c0   : > { %v5107_v14 = vpop.permute.xlu0 %1803 }
 0x1c2   : > { %1703 = vrot.lane.b32.xlu1 %v4993_v5, %s4594_s21  ;;  %1586 = vrot.lane.b32.xlu0 %v5003_v54, %s4591_s20 }
 0x1c3   : > { %4367 = vmatmul.mubr.msk.bf16.vlgmr.msra.gmra.mrb[40].mxu1 %vm1369_vm15, %v389_v8 }
 0x1c4   : > { %4151 = vmatmul.mubr.msk.bf16.vlgmr.msra.gmra.mrb[40].mxu0 %vm1369_vm15, %v389_v8  ;;  %4371 = vmatpush3.bf16.msra.mxu1 %v1594_v55  ;;  %v5116_v17 = vpop.permute.xlu0 %1811  ;;  %v1819_v8 = vsel %vm610_vm4, %v5107_v14, %v5096_v2  ;;  %v5281_v2 = vld [vmem:[#allocation2 + $0x10] sm:$0xff] }
 0x1c5   : > { %1609 = vmatpush1.bf16.msra.mxu0 %v1592_v56  ;;  %4372 = vmatprep.subr.bf16.mxu1 %v5997_v7 }
 0x1c6   : > { %1817 = vrot.lane.b32.xlu1 %v4993_v5, %s4595_s22  ;;  %1699 = vrot.lane.b32.xlu0 %v5003_v54, %s4594_s21 }
 0x1c7   : > { %4374 = vmatprep.mubr.msk.bf16.mxu1 %vm4593_vm0, %v5997_v7  ;;  %1640 = vmatprep.mubr.bf16.mxu0 %v5995_v0 }
 0x1c8   : > { %v5127_v19 = vpop.permute.xlu0 %1922 }
 0x1ca   : > { %1588 = vrot.lane.b32.xlu1 %v5021_v57, %s4591_s20  ;;  %1813 = vrot.lane.b32.xlu0 %v5003_v54, %s4595_s22 }
 0x1cc   : > { %v5137_v22 = vpop.permute.xlu0 %1920 }
 0x1cd   : > { %v1936_v13 = vsel %vm714_vm5, %v5137_v22, %v5127_v19  ;;  %v4161_v22 = vld [vmem:[%s5988_s4 + $0x6] sm:$0x3] }
 0x1ce   : > { %2154 = vrot.lane.b32.xlu1 %v4993_v5, %s4597_s24  ;;  %1930 = vrot.lane.b32.xlu0 %v5003_v54, %s4596_s23 }
 0x1d0   : > { %v5145_v24 = vpop.permute.xlu0 %1928 }
 0x1d2   : > { %1701 = vrot.lane.b32.xlu1 %v5021_v57, %s4594_s21  ;;  %2150 = vrot.lane.b32.xlu0 %v5003_v54, %s4597_s24 }
 0x1d4   : > { %v5157_v28 = vpop.permute.xlu0 %2146 }
 0x1d6   : > { %2148 = vrot.lane.b32.xlu1 %v4765_v12, %s4597_s24  ;;  %2261 = vrot.lane.b32.xlu0 %v4731_v11, %s4598_s25 }
 0x1da   : > { %1815 = vrot.lane.b32.xlu1 %v5021_v57, %s4595_s22  ;;  %2259 = vrot.lane.b32.xlu0 %v4723_v9, %s4598_s25 }
 0x1de   : > { %2263 = vrot.lane.b32.xlu1 %v4729_v10, %s4598_s25  ;;  %2267 = vrot.lane.b32.xlu0 %v5003_v54, %s4598_s25 }
 0x1e2   : > { %1932 = vrot.lane.b32.xlu1 %v5021_v57, %s4596_s23  ;;  %2378 = vrot.lane.b32.xlu0 %v4731_v11, %s4599_s26 }
 0x1e6   : > { %2156 = vrot.lane.b32.xlu1 %v2133_v58, %s4597_s24  ;;  %2376 = vrot.lane.b32.xlu0 %v4723_v9, %s4599_s26 }
 0x1ea   : > { %2271 = vrot.lane.b32.xlu1 %v4993_v5, %s4598_s25  ;;  %2152 = vrot.lane.b32.xlu0 %v5021_v57, %s4597_s24 }
 0x1ee   : > { %2265 = vrot.lane.b32.xlu1 %v4765_v12, %s4598_s25  ;;  %2384 = vrot.lane.b32.xlu0 %v5003_v54, %s4599_s26 }
 0x1f2   : > { %2380 = vrot.lane.b32.xlu1 %v4729_v10, %s4599_s26  ;;  %2269 = vrot.lane.b32.xlu0 %v5021_v57, %s4598_s25 }
 0x1f6   : > { %2273 = vrot.lane.b32.xlu1 %v2133_v58, %s4598_s25  ;;  %2495 = vrot.lane.b32.xlu0 %v4731_v11, %s4600_s27 }
 0x1fa   : > { %2388 = vrot.lane.b32.xlu1 %v4993_v5, %s4599_s26  ;;  %2386 = vrot.lane.b32.xlu0 %v5021_v57, %s4599_s26 }
 0x1fe   : > { %2382 = vrot.lane.b32.xlu1 %v4765_v12, %s4599_s26  ;;  %2493 = vrot.lane.b32.xlu0 %v4723_v9, %s4600_s27 }
 0x202   : > { %2497 = vrot.lane.b32.xlu1 %v4729_v10, %s4600_s27  ;;  %2503 = vrot.lane.b32.xlu0 %v5021_v57, %s4600_s27 }
 0x206   : > { %2390 = vrot.lane.b32.xlu1 %v2133_v58, %s4599_s26  ;;  %2501 = vrot.lane.b32.xlu0 %v5003_v54, %s4600_s27 }
 0x20a   : > { %2505 = vrot.lane.b32.xlu1 %v4993_v5, %s4600_s27  ;;  %2507 = vrot.lane.b32.xlu0 %v2133_v58, %s4600_s27 }
 0x20e   : > { %2499 = vrot.lane.b32.xlu1 %v4765_v12, %s4600_s27  ;;  %2765 = vrot.lane.b32.xlu0 %v4723_v9, %s4591_s20  ;;  %v5125_v12 = vpop.permute.xlu1 %1924 }
 0x212   : > { %2611 = vperm.xlu1 %4568, %v2608_v15   ;;  %2763 = vrot.lane.b32.xlu0 %v4703_v3, %s4591_s20  ;;  %v5135_v21 = vpop.permute.xlu1 %1926 }
 0x213   : > { %v1938_v1 = vsel %vm714_vm5, %v5125_v12, %v5135_v21 }
 0x216   : > { %2767 = vrot.lane.b32.xlu1 %v4731_v11, %s4591_s20  ;;  %2773 = vrot.lane.b32.xlu0 %v5003_v54, %s4591_s20 }
 0x21a   : > { %2638 = vrot.lane.b32.xlu1 %v4909_v26, %s4602_s15  ;;  %2769 = vrot.lane.b32.xlu0 %v4729_v10, %s4591_s20  ;;  %v5143_v26 = vpop.permute.xlu1 %2144 }
 0x21e   : > { %2771 = vrot.lane.b32.xlu1 %v4914_v27, %s4591_s20  ;;  %2777 = vrot.lane.b32.xlu0 %v4993_v5, %s4591_s20  ;;  %v5155_v25 = vpop.permute.xlu1 %2142 }
 0x222   : > { %2779 = vrot.lane.b32.xlu1 %v5133_v20, %s4591_s20  ;;  %2892 = vrot.lane.b32.xlu0 %v4723_v9, %s4594_s21 }
 0x226   : > { %2894 = vrot.lane.b32.xlu1 %v4731_v11, %s4594_s21  ;;  %2900 = vrot.lane.b32.xlu0 %v5003_v54, %s4594_s21 }
 0x22a   : > { %2890 = vrot.lane.b32.xlu1 %v4703_v3, %s4594_s21  ;;  %2896 = vrot.lane.b32.xlu0 %v4729_v10, %s4594_s21 }
 0x22e   : > { %2898 = vrot.lane.b32.xlu1 %v4914_v27, %s4594_s21  ;;  %2904 = vrot.lane.b32.xlu0 %v4993_v5, %s4594_s21 }
 0x230   : > { %v1591_v30 = vpop.permute.xlu1 %1590  ;;  %v5163_v31 = vpop.permute.xlu0 %1934 }
 0x232   : > { %2906 = vrot.lane.b32.xlu1 %v5133_v20, %s4594_s21  ;;  %3020 = vrot.lane.b32.xlu0 %v4723_v9, %s4595_s22 }
 0x234   : > { %v1704_v32 = vpop.permute.xlu1 %1703  ;;  %v1587_v33 = vpop.permute.xlu0 %1586 }
 0x236   : > { %3022 = vrot.lane.b32.xlu1 %v4731_v11, %s4595_s22  ;;  %3028 = vrot.lane.b32.xlu0 %v5003_v54, %s4595_s22 }
 0x238   : > { %v5173_v34 = vpop.permute.xlu1 %1817  ;;  %v1700_v35 = vpop.permute.xlu0 %1699 }
 0x23a   : > { %3018 = vrot.lane.b32.xlu1 %v4703_v3, %s4595_s22  ;;  %3024 = vrot.lane.b32.xlu0 %v4729_v10, %s4595_s22  ;;  %v1595_v3 = vsel %vm409_vm1, %v5062_v59, %v1587_v33  ;;  %v4153_v10 = vld [vmem:[%s5988_s4 + $0x2] sm:$0x3] }
 0x23c   : > { %v1589_v36 = vpop.permute.xlu1 %1588  ;;  %v5179_v37 = vpop.permute.xlu0 %1813 }
 0x23d   : > { %v1596_v38 = vsel %vm409_vm1, %v1587_v33, %v1589_v36  ;;  %v1597_v39 = vsel %vm409_vm1, %v1589_v36, %v1591_v30  ;;  %v1822_v60 = vsel %vm610_vm4, %v5116_v17, %v5179_v37  ;;  %v4572_v30 = vld [vmem:[#allocation2 + $0x10] sm:$0xff]  ;;  %v2159_v36 = vsel %vm915_vm6, %v5143_v26, %v5157_v28 }
 0x23e   : > { %3026 = vrot.lane.b32.xlu1 %v4914_v27, %s4595_s22  ;;  %3032 = vrot.lane.b32.xlu0 %v4993_v5, %s4595_s22 }
 0x23f   : > { %1610 = vmatprep.subr.bf16.mxu0 %v1596_v38  ;;  %4373 = vmatpush3.bf16.msra.mxu1 %v1597_v39 }
 0x240   : > { %1611 = vmatpush1.bf16.msra.mxu0 %v1595_v3  ;;  %v5192_v40 = vpop.permute.xlu1 %2154  ;;  %v5197_v42 = vpop.permute.xlu0 %1930  ;;  %4378 = vmatprep.subr.bf16.mxu1 %v5997_v7 }
 0x241   : > { %1720 = vmatprep.subr.bf16.mxu0 %v1706_v41 }
 0x242   : > { %4375 = vmatmul.mubr.msk.bf16.vlgmr.msra.gmra.mrb[44].mxu1 %vm1604_vm2, %v4153_v10  ;;  %3034 = vrot.lane.b32.xlu1 %v5133_v20, %s4595_s22 }
 0x243   : > { %3151 = vrot.lane.b32.xlu0 %v4723_v9, %s4596_s23  ;;  %4154 = vmatmul.mubr.msk.bf16.vlgmr.msra.gmra.mrb[44].mxu0 %vm1604_vm2, %v4153_v10  ;;  %v1708_v9 = vsel %vm509_vm3, %v5089_v63, %v1700_v35  ;;  %v1937_v63 = vsel %vm714_vm5, %v5127_v19, %v5125_v12  ;;  %v5299_v12 = vld [vmem:[#allocation2 + $0x8] sm:$0xff]  ;;  %v1939_v19 = vsel %vm714_vm5, %v5145_v24, %v5197_v42 }
 0x244   : > { %4379 = vmatpush3.bf16.msra.mxu1 %v1707_v44  ;;  %1721 = vmatpush1.bf16.msra.mxu0 %v1705_v43  ;;  %v1702_v45 = vpop.permute.xlu1 %1701  ;;  %v5212_v46 = vpop.permute.xlu0 %2150  ;;  %v4167_v10 = vld [vmem:[%s5988_s4 + $0xa] sm:$0x3] }
 0x245   : > { %4380 = vmatprep.subr.bf16.mxu1 %v5997_v7  ;;  %v1709_v47 = vsel %vm509_vm3, %v1700_v35, %v1702_v45  ;;  %v1710_v48 = vsel %vm509_vm3, %v1702_v45, %v1704_v32  ;;  %4382 = vmatprep.mubr.msk.bf16.mxu1 %vm4593_vm0, %v5997_v7  ;;  %v4573_v32 = vld [vmem:[#allocation2 + $0x8] sm:$0xff] }
 0x246   : > { %3153 = vrot.lane.b32.xlu1 %v4731_v11, %s4596_s23  ;;  %1722 = vmatprep.subr.bf16.mxu0 %v1709_v47  ;;  %v1557_v11 = vld [vmem:[%s5988_s4] sm:$0x3]  ;;  %v4164_v35 = vld [vmem:[%s5988_s4 + $0x8] sm:$0x3] }
 0x247   : > { %3159 = vrot.lane.b32.xlu0 %v5003_v54, %s4596_s23  ;;  %1752 = vmatprep.mubr.bf16.mxu0 %v5995_v0 }
 0x248   : > { %4381 = vmatpush3.bf16.msra.mxu1 %v1710_v48  ;;  %1723 = vmatpush1.bf16.msra.mxu0 %v1708_v9  ;;  %v5226_v49 = vpop.permute.xlu1 %2148  ;;  %v5231_v51 = vpop.permute.xlu0 %2261  ;;  %v4170_v9 = vld [vmem:[%s5988_s4 + $0xc] sm:$0x3] }
 0x249   : > { %1834 = vmatprep.subr.bf16.mxu0 %v1820_v50  ;;  %4386 = vmatprep.subr.bf16.mxu1 %v5997_v7 }
 0x24a   : > { %3149 = vrot.lane.b32.xlu1 %v4570_v52, %s4596_s23 }
 0x24b   : > { %4383 = vmatmul.mubr.msk.bf16.vlgmr.msra.gmra.mrb[48].mxu1 %vm1604_vm2, %v1557_v11  ;;  %3155 = vrot.lane.b32.xlu0 %v4571_v4, %s4596_s23 }
 0x24c   : > { %4156 = vmatmul.mubr.msk.bf16.vlgmr.msra.gmra.mrb[48].mxu0 %vm1604_vm2, %v1557_v11  ;;  %4387 = vmatpush3.bf16.msra.mxu1 %v1821_v53  ;;  %v1816_v55 = vpop.permute.xlu1 %1815  ;;  %v5247_v56 = vpop.permute.xlu0 %2259 }
 0x24d   : > { %1835 = vmatpush1.bf16.msra.mxu0 %v1819_v8  ;;  %4388 = vmatprep.subr.bf16.mxu1 %v5997_v7  ;;  %v1823_v58 = vsel %vm610_vm4, %v5179_v37, %v1816_v55  ;;  %v1824_v59 = vsel %vm610_vm4, %v1816_v55, %v5173_v34 }
 0x24e   : > { %3157 = vrot.lane.b32.xlu1 %v4914_v27, %s4596_s23  ;;  %1836 = vmatprep.subr.bf16.mxu0 %v1823_v58  ;;  %v4158_v27 = vld [vmem:[%s5988_s4 + $0x4] sm:$0x3] }
 0x24f   : > { %3163 = vrot.lane.b32.xlu0 %v4993_v5, %s4596_s23  ;;  %4390 = vmatprep.mubr.msk.bf16.mxu1 %vm4593_vm0, %v5997_v7 }
 0x250   : > { %4389 = vmatpush3.bf16.msra.mxu1 %v1824_v59  ;;  %v5263_v61 = vpop.permute.xlu1 %2263  ;;  %v5265_v62 = vpop.permute.xlu0 %2267  ;;  %1866 = vmatprep.mubr.bf16.mxu0 %v5995_v0  ;;  %v4173_v59 = vld [vmem:[%s5988_s4 + $0xe] sm:$0x3] }
 0x251   : > { %1837 = vmatpush1.bf16.msra.mxu0 %v1822_v60  ;;  %4394 = vmatprep.subr.bf16.mxu1 %v5997_v7 }
 0x252   : > { %1951 = vmatprep.subr.bf16.mxu0 %v1937_v63  ;;  %3165 = vrot.lane.b32.xlu1 %v5133_v20, %s4596_s23 }
 0x253   : > { %4391 = vmatmul.mubr.msk.bf16.vlgmr.msra.gmra.mrb[52].mxu1 %vm1604_vm2, %v4158_v27 }
 0x254   : > { %4159 = vmatmul.mubr.msk.bf16.vlgmr.msra.gmra.mrb[52].mxu0 %vm1604_vm2, %v4158_v27  ;;  %4395 = vmatpush3.bf16.msra.mxu1 %v1938_v1  ;;  %v1933_v14 = vpop.permute.xlu1 %1932  ;;  %v5287_v15 = vpop.permute.xlu0 %2378 }
 0x255   : > { %1952 = vmatpush1.bf16.msra.mxu0 %v1936_v13  ;;  %4396 = vmatprep.subr.bf16.mxu1 %v5997_v7  ;;  %v1940_v16 = vsel %vm714_vm5, %v5197_v42, %v1933_v14  ;;  %v1941_v17 = vsel %vm714_vm5, %v1933_v14, %v5163_v31  ;;  %v2275_v42 = vsel %vm1019_vm7, %v5247_v56, %v5231_v51 }
 0x256   : > { %3395 = vrot.lane.b32.xlu1 %v5281_v2, %s4597_s24  ;;  %1953 = vmatprep.subr.bf16.mxu0 %v1940_v16 }
 0x257   : > { %4398 = vmatprep.mubr.msk.bf16.mxu1 %vm4593_vm0, %v5997_v7  ;;  %1983 = vmatprep.mubr.bf16.mxu0 %v5995_v0 }
 0x258   : > { %4397 = vmatpush3.bf16.msra.mxu1 %v1941_v17  ;;  %v2157_v20 = vpop.permute.xlu1 %2156  ;;  %v5304_v21 = vpop.permute.xlu0 %2376 }
 0x259   : > { %1954 = vmatpush1.bf16.msra.mxu0 %v1939_v19  ;;  %4402 = vmatprep.subr.bf16.mxu1 %v5997_v7 }
 0x25a   : > { %3393 = vrot.lane.b32.xlu1 %v5299_v12, %s4597_s24  ;;  %2040 = vmatprep.subr.bf16.mxu0 %v4572_v30 }
 0x25b   : > { %4399 = vmatmul.mubr.msk.bf16.vlgmr.msra.gmra.mrb[56].mxu1 %vm1604_vm2, %v4161_v22 }
 0x25c   : > { %4162 = vmatmul.mubr.msk.bf16.vlgmr.msra.gmra.mrb[56].mxu0 %vm1604_vm2, %v4161_v22  ;;  %4403 = vmatpush3.bf16.msra.mxu1 %v4571_v4  ;;  %v2272_v24 = vpop.permute.xlu1 %2271  ;;  %v2153_v31 = vpop.permute.xlu0 %2152 }
 0x25d   : > { %2041 = vmatpush1.bf16.msra.mxu0 %v4573_v32  ;;  %4404 = vmatprep.subr.bf16.mxu1 %v5997_v7  ;;  %v2162_v39 = vsel %vm915_vm6, %v2153_v31, %v5192_v40 }
 0x25e   : > { %2042 = vmatprep.subr.bf16.mxu0 %v5021_v57  ;;  %2775 = vrot.lane.b32.xlu1 %v5021_v57, %s4591_s20 }
 0x25f   : > { %4406 = vmatprep.mubr.msk.bf16.mxu1 %vm4593_vm0, %v5997_v7  ;;  %2072 = vmatprep.mubr.bf16.mxu0 %v5995_v0 }
 0x260   : > { %4405 = vmatpush3.bf16.msra.mxu1 %v4993_v5  ;;  %v2266_v33 = vpop.permute.xlu1 %2265  ;;  %v5322_v34 = vpop.permute.xlu0 %2384  ;;  %v2160_v5 = vsel %vm915_vm6, %v5157_v28, %v5226_v49  ;;  %v2163_v28 = vsel %vm915_vm6, %v5192_v40, %v2157_v20  ;;  %v2276_v40 = vsel %vm1019_vm7, %v5231_v51, %v5263_v61  ;;  %v2392_v51 = vsel %vm1123_vm8, %v5304_v21, %v5287_v15 }
 0x261   : > { %2043 = vmatpush1.bf16.msra.mxu0 %v5003_v54  ;;  %4410 = vmatprep.subr.bf16.mxu1 %v5997_v7  ;;  %v2158_v54 = vsel %vm915_vm6, %v5155_v25, %v5143_v26  ;;  %v2161_v26 = vsel %vm915_vm6, %v5212_v46, %v2153_v31  ;;  %v2277_v41 = vsel %vm1019_vm7, %v5263_v61, %v2266_v33 }
 0x262   : > { %2173 = vmatprep.subr.bf16.mxu0 %v2159_v36  ;;  %2902 = vrot.lane.b32.xlu1 %v5021_v57, %s4594_s21 }
 0x263   : > { %4407 = vmatmul.mubr.msk.bf16.vlgmr.msra.gmra.mrb[60].mxu1 %vm1604_vm2, %v4164_v35 }
 0x264   : > { %4165 = vmatmul.mubr.msk.bf16.vlgmr.msra.gmra.mrb[60].mxu0 %vm1604_vm2, %v4164_v35  ;;  %4411 = vmatpush3.bf16.msra.mxu1 %v2160_v5  ;;  %v2381_v37 = vpop.permute.xlu1 %2380  ;;  %v2270_v38 = vpop.permute.xlu0 %2269 }
 0x265   : > { %2174 = vmatpush1.bf16.msra.mxu0 %v2158_v54  ;;  %4412 = vmatprep.subr.bf16.mxu1 %v5997_v7  ;;  %v2279_v45 = vsel %vm1019_vm7, %v2270_v38, %v2272_v24  ;;  %v2278_v46 = vsel %vm1019_vm7, %v5265_v62, %v2270_v38  ;;  %v2393_v50 = vsel %vm1123_vm8, %v5287_v15, %v2381_v37  ;;  %v4176_v15 = vld [vmem:[%s5988_s4 + $0x10] sm:$0x3] }
 0x266   : > { %2175 = vmatprep.subr.bf16.mxu0 %v2162_v39  ;;  %3030 = vrot.lane.b32.xlu1 %v5021_v57, %s4595_s22 }
 0x267   : > { %4414 = vmatprep.mubr.msk.bf16.mxu1 %vm4593_vm0, %v5997_v7  ;;  %2205 = vmatprep.mubr.bf16.mxu0 %v5995_v0 }
 0x268   : > { %4413 = vmatpush3.bf16.msra.mxu1 %v2163_v28  ;;  %v2274_v25 = vpop.permute.xlu1 %2273  ;;  %v2496_v3 = vpop.permute.xlu0 %2495 }
 0x269   : > { %2176 = vmatpush1.bf16.msra.mxu0 %v2161_v26  ;;  %4418 = vmatprep.subr.bf16.mxu1 %v5997_v7 }
 0x26a   : > { %2290 = vmatprep.subr.bf16.mxu0 %v2276_v40  ;;  %3161 = vrot.lane.b32.xlu1 %v5021_v57, %s4596_s23  ;;  %v2280_v57 = vsel %vm1019_vm7, %v2272_v24, %v2274_v25 }
 0x26b   : > { %4415 = vmatmul.mubr.msk.bf16.vlgmr.msra.gmra.mrb[64].mxu1 %vm1604_vm2, %v4167_v10 }
 0x26c   : > { %4168 = vmatmul.mubr.msk.bf16.vlgmr.msra.gmra.mrb[64].mxu0 %vm1604_vm2, %v4167_v10  ;;  %4419 = vmatpush3.bf16.msra.mxu1 %v2277_v41  ;;  %v2389_v43 = vpop.permute.xlu1 %2388  ;;  %v2387_v44 = vpop.permute.xlu0 %2386 }
 0x26d   : > { %2291 = vmatpush1.bf16.msra.mxu0 %v2275_v42  ;;  %4420 = vmatprep.subr.bf16.mxu1 %v5997_v7  ;;  %v2396_v53 = vsel %vm1123_vm8, %v2387_v44, %v2389_v43  ;;  %v2395_v4 = vsel %vm1123_vm8, %v5322_v34, %v2387_v44 }
 0x26e   : > { %2292 = vmatprep.subr.bf16.mxu0 %v2279_v45  ;;  %4422 = vmatprep.mubr.msk.bf16.mxu1 %vm4593_vm0, %v5997_v7 }
 0x26f   : > { %2322 = vmatprep.mubr.bf16.mxu0 %v5995_v0 }
 0x270   : > { %4421 = vmatpush3.bf16.msra.mxu1 %v2280_v57  ;;  %v2383_v47 = vpop.permute.xlu1 %2382  ;;  %v2494_v48 = vpop.permute.xlu0 %2493 }
 0x271   : > { %2293 = vmatpush1.bf16.msra.mxu0 %v2278_v46  ;;  %v2394_v49 = vsel %vm1123_vm8, %v2381_v37, %v2383_v47  ;;  %4426 = vmatprep.subr.bf16.mxu1 %v5997_v7  ;;  %v2509_v60 = vsel %vm1227_vm9, %v2494_v48, %v2496_v3 }
 0x272   : > { %2407 = vmatprep.subr.bf16.mxu0 %v2393_v50 }
 0x273   : > { %4423 = vmatmul.mubr.msk.bf16.vlgmr.msra.gmra.mrb[68].mxu1 %vm1604_vm2, %v4170_v9 }
 0x274   : > { %4171 = vmatmul.mubr.msk.bf16.vlgmr.msra.gmra.mrb[68].mxu0 %vm1604_vm2, %v4170_v9  ;;  %4427 = vmatpush3.bf16.msra.mxu1 %v2394_v49  ;;  %v2498_v11 = vpop.permute.xlu1 %2497  ;;  %v2504_v52 = vpop.permute.xlu0 %2503 }
 0x275   : > { %2408 = vmatpush1.bf16.msra.mxu0 %v2392_v51  ;;  %2439 = vmatprep.mubr.bf16.mxu0 %v5995_v0  ;;  %v2510_v58 = vsel %vm1227_vm9, %v2496_v3, %v2498_v11 }
 0x276   : > { %2409 = vmatprep.subr.bf16.mxu0 %v2396_v53  ;;  %4428 = vmatprep.subr.bf16.mxu1 %v5997_v7 }
 0x277   : > { %4430 = vmatprep.mubr.msk.bf16.mxu1 %vm4593_vm0, %v5997_v7 }
 0x278   : > { %v2391_v8 = vpop.permute.xlu1 %2390  ;;  %v2502_v55 = vpop.permute.xlu0 %2501 }
 0x279   : > { %2410 = vmatpush1.bf16.msra.mxu0 %v2395_v4  ;;  %v2397_v56 = vsel %vm1123_vm8, %v2389_v43, %v2391_v8  ;;  %v2512_v63 = vsel %vm1227_vm9, %v2502_v55, %v2504_v52 }
 0x27a   : > { %2524 = vmatprep.subr.bf16.mxu0 %v2510_v58  ;;  %4429 = vmatpush3.bf16.msra.mxu1 %v2397_v56 }
 0x27b   : > { %4434 = vmatprep.subr.bf16.mxu1 %v5997_v7 }
 0x27c   : > { %4174 = vmatmul.mubr.msk.bf16.vlgmr.msra.gmra.mrb[72].mxu0 %vm1604_vm2, %v4173_v59  ;;  %v2506_v61 = vpop.permute.xlu1 %2505  ;;  %v2508_v62 = vpop.permute.xlu0 %2507 }
 0x27d   : > { %2525 = vmatpush1.bf16.msra.mxu0 %v2509_v60  ;;  %4431 = vmatmul.mubr.msk.bf16.vlgmr.msra.gmra.mrb[72].mxu1 %vm1604_vm2, %v4173_v59  ;;  %v2513_v27 = vsel %vm1227_vm9, %v2504_v52, %v2506_v61  ;;  %v2514_v17 = vsel %vm1227_vm9, %v2506_v61, %v2508_v62 }
 0x27e   : > { %2526 = vmatprep.subr.bf16.mxu0 %v2513_v27  ;;  %2556 = vmatprep.mubr.bf16.mxu0 %v5995_v0 }
 0x27f   : > { %4438 = vmatprep.mubr.msk.bf16.mxu1 %vm4593_vm0, %v5997_v7 }
 0x280   : > { %v2500_v1 = vpop.permute.xlu1 %2499  ;;  %v5411_v13 = vpop.permute.xlu0 %2765 }
 0x281   : > { %2527 = vmatpush1.bf16.msra.mxu0 %v2512_v63  ;;  %v2511_v14 = vsel %vm1227_vm9, %v2498_v11, %v2500_v1 }
 0x282   : > { %4435 = vmatpush3.bf16.msra.mxu1 %v2511_v14  ;;  %v5497_v14 = vld [vmem:[#allocation2 + $0x18] sm:$0xff] }
 0x283   : > { %4436 = vmatprep.subr.bf16.mxu1 %v5997_v7  ;;  %3397 = vrot.lane.b32.xlu0 %v5497_v14, %s4597_s24 }
 0x284   : > { %4177 = vmatmul.mubr.msk.bf16.vlgmr.msra.gmra.mrb[76].mxu0 %vm1604_vm2, %v4176_v15  ;;  %v5419_v16 = vpop.permute.xlu0 %2763 }
 0x285   : > { %2684 = vmatprep.mubr.bf16.mxu0 %v5995_v0 }
 0x286   : > { %4437 = vmatpush3.bf16.msra.mxu1 %v2514_v17 }
 0x287   : > { %4442 = vmatprep.subr.bf16.mxu1 %v5997_v7 }
 0x288   : > { %v5424_v19 = vpop.permute.xlu0 %2773 }
 0x289   : > { %4439 = vmatmul.mubr.msk.bf16.vlgmr.msra.gmra.mrb[76].mxu1 %vm1604_vm2, %v4176_v15 }
 0x28a   : > { %4444 = vmatprep.mubr.msk.bf16.mxu1 %vm4593_vm0, %v5997_v7 }
 0x28c   : > { %v5429_v20 = vpop.permute.xlu0 %2769 }
 0x28d   : > { %v1458_v21 = vpop.f32.mrb[36].mxu1 }
 0x28e   : > { %v4362_v22 = vpop.f32.mrb[37].mxu1 }
 0x28f   : > { %v1417_v30 = vpop.f32.mrb[36].mxu0  ;;  %v1461_v24 = vpop.f32.mrb[38].mxu1 }
 0x290   : > { %v5431_v31 = vpop.permute.xlu0 %2777  ;;  %v1419_v32 = vpop.f32.mrb[37].mxu0 }
 0x291   : > { %v5433_v33 = vpop.permute.xlu1 %2611  ;;  %v1421_v34 = vpop.f32.mrb[38].mxu0 }
 0x292   : > { %v1422_v35 = vpop.f32.mrb[39].mxu0  ;;  %v4363_v36 = vpop.f32.mrb[39].mxu1 }
 0x294   : > { %v5437_v54 = vpop.permute.xlu0 %2892 }
 0x295   : > { %v5435_v5 = vpop.permute.xlu1 %2767 }
 0x296   : > { %v1551_v37 = vpop.f32.mrb[40].mxu1 }
 0x297   : > { %v1510_v38 = vpop.f32.mrb[40].mxu0  ;;  %v5439_v39 = vadd.f32 %v1551_v37, %v1458_v21  ;;  %v4368_v28 = vpop.f32.mrb[41].mxu1 }
 0x298   : > { %v5441_v26 = vadd.f32 %v1510_v38, %v1417_v30  ;;  %v1512_v25 = vpop.f32.mrb[41].mxu0  ;;  %v1554_v40 = vpop.f32.mrb[42].mxu1 }
 0x299   : > { %v5443_v3 = vpop.permute.xlu1 %2638  ;;  %v5445_v10 = vadd.f32 %v1512_v25, %v1419_v32  ;;  %v4369_v41 = vpop.f32.mrb[43].mxu1 }
 0x29a   : > { %v1514_v42 = vpop.f32.mrb[42].mxu0  ;;  %v5447_v44 = vpop.permute.xlu0 %2900 }
 0x29b   : > { %v1515_v43 = vpop.f32.mrb[43].mxu0 }
 0x29d   : > { %v5449_v45 = vpop.permute.xlu1 %2771 }
 0x29e   : > { %v5453_v46 = vpop.permute.xlu0 %2896 }
 0x2a1   : > { %v5451_v57 = vpop.permute.xlu1 %2779 }
 0x2a2   : > { %v5457_v48 = vpop.permute.xlu0 %2904 }
 0x2a5   : > { %v5455_v47 = vpop.permute.xlu1 %2894 }
 0x2a6   : > { %v5463_v50 = vpop.permute.xlu0 %3020 }
 0x2a9   : > { %v5459_v9 = vpop.permute.xlu1 %2890 }
 0x2aa   : > { %v5467_v11 = vpop.permute.xlu0 %3028 }
 0x2ad   : > { %v5461_v49 = vpop.permute.xlu1 %2898 }
 0x2ae   : > { %v5473_v4 = vpop.permute.xlu0 %3024 }
 0x2b1   : > { %v5465_v51 = vpop.permute.xlu1 %2906 }
 0x2b2   : > { %v5479_v56 = vpop.permute.xlu0 %3032 }
 0x2b5   : > { %v5469_v52 = vpop.permute.xlu1 %3022 }
 0x2b6   : > { %v5485_v60 = vpop.permute.xlu0 %3151 }
 0x2b9   : > { %v5471_v53 = vpop.permute.xlu1 %3018 }
 0x2ba   : > { %v5491_v27 = vpop.permute.xlu0 %3159 }
 0x2bd   : > { %v3027_v8 = vpop.permute.xlu1 %3026 }
 0x2be   : > { %v5477_v55 = vsel %vm610_vm4, %v3027_v8, %v5467_v11 }
 0x2c1   : > { %v5481_v58 = vpop.permute.xlu1 %3034 }
 0x2c5   : > { %v5483_v59 = vpop.permute.xlu1 %3153 }
 0x2c9   : > { %v3150_v61 = vpop.permute.xlu1 %3149 }
 0x2ca   : > { %v5489_v62 = vsel %vm714_vm5, %v3150_v61, %v5485_v60 }
 0x2cd   : > { %v3158_v63 = vpop.permute.xlu1 %3157 }
 0x2ce   : > { %v5495_v1 = vsel %vm714_vm5, %v3158_v63, %v5491_v27 }
 0x315   : > { %v1683_v15 = vpop.f32.mrb[44].mxu1 }
 0x316   : > { %v4376_v17 = vpop.f32.mrb[45].mxu1  ;;  %v1642_v21 = vpop.f32.mrb[44].mxu0 }
 0x317   : > { %v1686_v22 = vpop.f32.mrb[46].mxu1  ;;  %v1644_v30 = vpop.f32.mrb[45].mxu0 }
 0x318   : > { %v4377_v24 = vpop.f32.mrb[47].mxu1  ;;  %v1646_v32 = vpop.f32.mrb[46].mxu0 }
 0x319   : > { %v1647_v34 = vpop.f32.mrb[47].mxu0 }
 0x31e   : > { %v1795_v35 = vpop.f32.mrb[48].mxu1 }
 0x31f   : > { %v1796_v36 = vadd.f32 %v1795_v35, %v1683_v15  ;;  %v4384_v37 = vpop.f32.mrb[49].mxu1  ;;  %v1754_v38 = vpop.f32.mrb[48].mxu0 }
 0x320   : > { %v1798_v28 = vpop.f32.mrb[50].mxu1  ;;  %v1755_v25 = vadd.f32 %v1754_v38, %v1642_v21  ;;  %v1756_v40 = vpop.f32.mrb[49].mxu0 }
 0x321   : > { %v4385_v41 = vpop.f32.mrb[51].mxu1  ;;  %v1757_v42 = vadd.f32 %v1756_v40, %v1644_v30  ;;  %v1758_v43 = vpop.f32.mrb[50].mxu0 }
 0x322   : > { %v1759_v8 = vpop.f32.mrb[51].mxu0 }
 0x326   : > { %v1909_v61 = vpop.f32.mrb[52].mxu1 }
 0x327   : > { %v1917_v63 = vadd.f32 %v1909_v61, %v1796_v36  ;;  %v4392_v17 = vpop.f32.mrb[53].mxu1  ;;  %v1868_v0 = vpop.f32.mrb[52].mxu0 }
 0x328   : > { %v1915_v22 = vadd.f32 %v1868_v0, %v1755_v25  ;;  %v1912_v7 = vpop.f32.mrb[54].mxu1  ;;  %v1870_v24 = vpop.f32.mrb[53].mxu0 }
 0x329   : > { %v1916_v32 = vadd.f32 %v1870_v24, %v1757_v42  ;;  %v4393_v34 = vpop.f32.mrb[55].mxu1  ;;  %v1872_v6 = vpop.f32.mrb[54].mxu0 }
 0x32a   : > { %v1873_v15 = vpop.f32.mrb[55].mxu0 }
 0x32e   : > { %v2026_v35 = vpop.f32.mrb[56].mxu1 }
 0x32f   : > { %v2034_v37 = vadd.f32 %v2026_v35, %v1917_v63  ;;  %v1985_v28 = vpop.f32.mrb[56].mxu0  ;;  %v4400_v21 = vpop.f32.mrb[57].mxu1 }
 0x330   : > { %v2032_v38 = vadd.f32 %v1985_v28, %v1915_v22  ;;  %v1987_v41 = vpop.f32.mrb[57].mxu0  ;;  %v2029_v30 = vpop.f32.mrb[58].mxu1 }
 0x331   : > { %v2033_v40 = vadd.f32 %v1987_v41, %v1916_v32  ;;  %v1989_v43 = vpop.f32.mrb[58].mxu0  ;;  %v4401_v8 = vpop.f32.mrb[59].mxu1 }
 0x332   : > { %v1990_v36 = vpop.f32.mrb[59].mxu0 }
 0x336   : > { %v2115_v61 = vpop.f32.mrb[60].mxu1 }
 0x337   : > { %v2123_v17 = vadd.f32 %v2115_v61, %v2034_v37  ;;  %v2074_v0 = vpop.f32.mrb[60].mxu0  ;;  %v4408_v7 = vpop.f32.mrb[61].mxu1 }
 0x338   : > { %v2121_v25 = vadd.f32 %v2074_v0, %v2032_v38  ;;  %v2076_v42 = vpop.f32.mrb[61].mxu0  ;;  %v2118_v24 = vpop.f32.mrb[62].mxu1 }
 0x339   : > { %v2122_v6 = vadd.f32 %v2076_v42, %v2033_v40  ;;  %v2078_v34 = vpop.f32.mrb[62].mxu0  ;;  %v4409_v15 = vpop.f32.mrb[63].mxu1 }
 0x33a   : > { %v2079_v63 = vpop.f32.mrb[63].mxu0 }
 0x33e   : > { %v2248_v35 = vpop.f32.mrb[64].mxu1 }
 0x33f   : > { %v2256_v21 = vadd.f32 %v2248_v35, %v2123_v17  ;;  %v2207_v22 = vpop.f32.mrb[64].mxu0  ;;  %v4416_v28 = vpop.f32.mrb[65].mxu1 }
 0x340   : > { %v2254_v30 = vadd.f32 %v2207_v22, %v2121_v25  ;;  %v2209_v32 = vpop.f32.mrb[65].mxu0  ;;  %v2251_v41 = vpop.f32.mrb[66].mxu1 }
 0x341   : > { %v2255_v43 = vadd.f32 %v2209_v32, %v2122_v6  ;;  %v2211_v8 = vpop.f32.mrb[66].mxu0  ;;  %v4417_v36 = vpop.f32.mrb[67].mxu1 }
 0x342   : > { %v2212_v37 = vpop.f32.mrb[67].mxu0  ;;  %v5501_v35 = vpop.permute.xlu1 %3165 }
 0x346   : > { %v2365_v61 = vpop.f32.mrb[68].mxu1 }
 0x347   : > { %v2373_v7 = vadd.f32 %v2365_v61, %v2256_v21  ;;  %v2324_v38 = vpop.f32.mrb[68].mxu0  ;;  %v4424_v0 = vpop.f32.mrb[69].mxu1 }
 0x348   : > { %v2371_v24 = vadd.f32 %v2324_v38, %v2254_v30  ;;  %v2326_v40 = vpop.f32.mrb[69].mxu0  ;;  %v2368_v42 = vpop.f32.mrb[70].mxu1 }
 0x349   : > { %v2372_v34 = vadd.f32 %v2326_v40, %v2255_v43  ;;  %v2328_v15 = vpop.f32.mrb[70].mxu0  ;;  %v4425_v63 = vpop.f32.mrb[71].mxu1 }
 0x34a   : > { %v2329_v17 = vpop.f32.mrb[71].mxu0  ;;  %v5503_v38 = vpop.permute.xlu1 %3395 }
 0x34f   : > { %v2441_v25 = vpop.f32.mrb[72].mxu0 }
 0x350   : > { %v2488_v22 = vadd.f32 %v2441_v25, %v2371_v24  ;;  %v2443_v28 = vpop.f32.mrb[73].mxu0  ;;  %v2482_v6 = vpop.f32.mrb[72].mxu1 }
 0x351   : > { %v2489_v32 = vadd.f32 %v2443_v28, %v2372_v34  ;;  %v2490_v41 = vadd.f32 %v2482_v6, %v2373_v7  ;;  %v4432_v8 = vpop.f32.mrb[73].mxu1  ;;  %v2445_v36 = vpop.f32.mrb[74].mxu0 }
 0x352   : > { %v2485_v21 = vpop.f32.mrb[74].mxu1  ;;  %v2446_v37 = vpop.f32.mrb[75].mxu0 }
 0x353   : > { %v4433_v61 = vpop.f32.mrb[75].mxu1  ;;  %v5507_v6 = vpop.permute.xlu1 %3393 }
 0x357   : > { %v2558_v30 = vpop.f32.mrb[76].mxu0 }
 0x358   : > { %v2605_v43 = vadd.f32 %v2558_v30, %v2488_v22  ;;  %v2560_v0 = vpop.f32.mrb[77].mxu0 }
 0x359   : > { %v2606_v40 = vadd.f32 %v2560_v0, %v2489_v32  ;;  %v2562_v42 = vpop.f32.mrb[78].mxu0 }
 0x35a   : > { %v2614_v15 = vadd.f32 %v5433_v33, %v2605_v43  ;;  %v2563_v63 = vpop.f32.mrb[79].mxu0 }
 0x35b   : > { %v2615_v24 = vadd.f32 %v5433_v33, %v2606_v40  ;;  %v2776_v40 = vpop.permute.xlu1 %2775 }
 0x35c   : > { %v2617_v17 = vmax.f32 %v2614_v15, 0.0  ;;  %v2599_v34 = vpop.f32.mrb[76].mxu1  ;;  %v2791_v63 = vsel %vm409_vm1, %v5424_v19, %v2776_v40 }
 0x35d   : > { %v2618_v7 = vmax.f32 %v2615_v24, 0.0  ;;  %v2607_v25 = vadd.f32 %v2599_v34, %v2490_v41  ;;  %v4440_v28 = vpop.f32.mrb[77].mxu1  ;;  %v2788_v41 = vsel %vm409_vm1, %v5411_v13, %v5435_v5  ;;  %v6002_v24 = vmov 0.0  }
 0x35e   : > { %v2620_v8 = vsel %vm1346_vm12, %v2617_v17, 0.0  ;;  %v2602_v36 = vpop.f32.mrb[78].mxu1  ;;  %v6003_v17 = vmov 0   ;;  %v2790_v34 = vsel %vm409_vm1, %v5449_v45, %v5424_v19  ;;  %v3373_v19 = vld [vmem:[#allocation2 + $0x30] sm:$0xff]  ;;  %v3372_v45 = vld [vmem:[#allocation2 + $0x20] sm:$0xff] }
 0x35f   : > { %v2623_v22 = vpack.c.bf16 %v2620_v8, %v2620_v8  ;;  %v2621_v32 = vsel %vm1347_vm13, %v2618_v7, 0.0  ;;  %v2616_v21 = vadd.f32 %v5433_v33, %v2607_v25  ;;  %v4441_v37 = vpop.f32.mrb[79].mxu1  ;;  %v2787_v33 = vsel %vm409_vm1, %v5419_v16, %v5411_v13  ;;  %v3376_v25 = vld [vmem:[#allocation2 + $0x48] sm:$0xff]  ;;  %v3380_v28 = vld [vmem:[#allocation2 + $0x70] sm:$0xff]  ;;  %v5638_v8 = vpop.permute.xlu0 %3155 }
 0x360   : > { %v2624_v61 = vpack.c.bf16 %v2621_v32, %v2621_v32  ;;  %v2789_v13 = vsel %vm409_vm1, %v5435_v5, %v5429_v20  ;;  %v3375_v20 = vld [vmem:[#allocation2 + $0x40] sm:$0xff]  ;;  %v2792_v7 = vsel %vm409_vm1, %v2776_v40, %v5431_v31  ;;  %v2916_v40 = vsel %vm509_vm3, %v5455_v47, %v5453_v46 }
 0x361   : > { %2626 = vst [vmem:[#allocation2 + $0x58] sm:$0x3] %v2623_v22  ;;  %v2619_v30 = vmax.f32 %v2616_v21, 0.0  ;;  %v2644_v43 = vsel %vm1373_vm14, %v2623_v22, 0 }
 0x362   : > { %2627 = vst [vmem:[#allocation2 + $0x60] sm:$0x3] %v2624_v61  ;;  %4180 = vmatprep.subr.msk.bf16.mxu0 %vm1373_vm14, %v2624_v61 }
 0x363   : > { %v2622_v0 = vsel %vm1348_vm11, %v2619_v30, 0.0  ;;  %2653 = vmatpush1.bf16.msra.mxu0 %v2644_v43  ;;  %v5648_v22 = vpop.permute.xlu0 %3163 }
 0x364   : > { %v2625_v42 = vpack.c.bf16 %v2622_v0, %v2622_v0  ;;  %2809 = vmatprep.subr.bf16.mxu0 %v2788_v41  ;;  %v4183_v41 = vld [vmem:[%s5990_s6 + $0x2] sm:$0x3] }
 0x366   : > { %2628 = vst [vmem:[#allocation2 + $0x68] sm:$0x3] %v2625_v42  ;;  %4181 = vmatmul.mubr.msk.bf16.vlgmr.msra.gmra.mrb[80].mxu0 %vm1369_vm15, %v5443_v3  ;;  %v2650_v15 = vsel %vm1373_vm14, %v2625_v42, 0 }
 0x367   : > { %2810 = vmatpush1.bf16.msra.mxu0 %v2787_v33  ;;  %4443 = vmatpush3.bf16.msra.mxu1 %v2650_v15  ;;  %v5653_v21 = vpop.permute.xlu0 %3397  ;;  %v4209_v42 = vld.sshfl [vmem:[%s5992_s8] sm:$0x3 pattern:$0x76325410] }
 0x368   : > { %2811 = vmatprep.subr.bf16.mxu0 %v2791_v63  ;;  %4448 = vmatprep.subr.bf16.mxu1 %v6002_v24  ;;  %v5565_v31 = vld [vmem:[#allocation2 + $0x58] sm:$0xff] }
 0x369   : > { %v5533_v16 = vld [vmem:[#allocation2 + $0x60] sm:$0xff]  ;;  %2841 = vmatprep.mubr.bf16.mxu0 %v6003_v17 }
 0x36a   : > { %2783 = vrot.lane.b32.xlu1 %v5533_v16, %s4591_s20  ;;  %4445 = vmatmul.mubr.msk.bf16.vlgmr.msra.gmra.mrb[80].mxu1 %vm1369_vm15, %v5443_v3  ;;  %v3374_v3 = vld [vmem:[#allocation2 + $0x38] sm:$0xff] }
 0x36b   : > { %2812 = vmatpush1.bf16.msra.mxu0 %v2790_v34  ;;  %4449 = vmatpush3.bf16.msra.mxu1 %v2789_v13 }
 0x36c   : > { %4450 = vmatprep.subr.bf16.mxu1 %v6002_v24  ;;  %4454 = vmatprep.mubr.msk.bf16.mxu1 %vm4593_vm0, %v6002_v24 }
 0x36d   : > { %v5546_v5 = vld [vmem:[#allocation2 + $0x68] sm:$0xff] }
 0x36e   : > { %3405 = vrot.lane.b32.xlu1 %v3375_v20, %s4597_s24  ;;  %2785 = vrot.lane.b32.xlu0 %v5546_v5, %s4591_s20 }
 0x36f   : > { %4451 = vmatpush3.bf16.msra.mxu1 %v2792_v7  ;;  %v2736_v7 = vld [vmem:[%s5990_s6] sm:$0x3] }
 0x370   : > { %4452 = vmatprep.subr.bf16.mxu1 %v6002_v24 }
 0x372   : > { %3401 = vrot.lane.b32.xlu1 %v3373_v19, %s4597_s24  ;;  %2912 = vrot.lane.b32.xlu0 %v5546_v5, %s4594_s21 }
 0x376   : > { %2910 = vrot.lane.b32.xlu1 %v5533_v16, %s4594_s21  ;;  %3040 = vrot.lane.b32.xlu0 %v5546_v5, %s4595_s22 }
 0x37a   : > { %3413 = vrot.lane.b32.xlu1 %v5546_v5, %s4597_s24  ;;  %3171 = vrot.lane.b32.xlu0 %v5546_v5, %s4596_s23 }
 0x37e   : > { %3409 = vrot.lane.b32.xlu1 %v5565_v31, %s4597_s24  ;;  %2781 = vrot.lane.b32.xlu0 %v5565_v31, %s4591_s20 }
 0x382   : > { %3038 = vrot.lane.b32.xlu1 %v5533_v16, %s4595_s22  ;;  %3403 = vrot.lane.b32.xlu0 %v3374_v3, %s4597_s24 }
 0x386   : > { %3528 = vrot.lane.b32.xlu1 %v5497_v14, %s4598_s25  ;;  %2908 = vrot.lane.b32.xlu0 %v5565_v31, %s4594_s21 }
 0x38a   : > { %3524 = vrot.lane.b32.xlu1 %v5299_v12, %s4598_s25  ;;  %3036 = vrot.lane.b32.xlu0 %v5565_v31, %s4595_s22 }
 0x38e   : > { %3169 = vrot.lane.b32.xlu1 %v5533_v16, %s4596_s23  ;;  %3167 = vrot.lane.b32.xlu0 %v5565_v31, %s4596_s23 }
 0x392   : > { %3536 = vrot.lane.b32.xlu1 %v3375_v20, %s4598_s25  ;;  %3399 = vrot.lane.b32.xlu0 %v3372_v45, %s4597_s24 }
 0x396   : > { %3532 = vrot.lane.b32.xlu1 %v3373_v19, %s4598_s25  ;;  %3407 = vrot.lane.b32.xlu0 %v3376_v25, %s4597_s24 }
 0x39a   : > { %3544 = vrot.lane.b32.xlu1 %v5546_v5, %s4598_s25  ;;  %3526 = vrot.lane.b32.xlu0 %v5281_v2, %s4598_s25 }
 0x39e   : > { %3540 = vrot.lane.b32.xlu1 %v5565_v31, %s4598_s25  ;;  %3415 = vrot.lane.b32.xlu0 %v3380_v28, %s4597_s24 }
 0x3a2   : > { %3659 = vrot.lane.b32.xlu1 %v5497_v14, %s4599_s26  ;;  %3534 = vrot.lane.b32.xlu0 %v3374_v3, %s4598_s25 }
 0x3a6   : > { %3655 = vrot.lane.b32.xlu1 %v5299_v12, %s4599_s26  ;;  %3530 = vrot.lane.b32.xlu0 %v3372_v45, %s4598_s25 }
 0x3aa   : > { %3667 = vrot.lane.b32.xlu1 %v3375_v20, %s4599_s26  ;;  %3538 = vrot.lane.b32.xlu0 %v3376_v25, %s4598_s25 }
 0x3ae   : > { %3663 = vrot.lane.b32.xlu1 %v3373_v19, %s4599_s26  ;;  %3657 = vrot.lane.b32.xlu0 %v5281_v2, %s4599_s26 }
 0x3b2   : > { %3675 = vrot.lane.b32.xlu1 %v5546_v5, %s4599_s26  ;;  %3546 = vrot.lane.b32.xlu0 %v3380_v28, %s4598_s25 }
 0x3b6   : > { %3671 = vrot.lane.b32.xlu1 %v5565_v31, %s4599_s26  ;;  %3665 = vrot.lane.b32.xlu0 %v3374_v3, %s4599_s26 }
 0x3ba   : > { %3790 = vrot.lane.b32.xlu1 %v5497_v14, %s4600_s27  ;;  %3411 = vrot.lane.b32.xlu0 %v5533_v16, %s4597_s24  ;;  %v5630_v14 = vpop.permute.xlu1 %2902 }
 0x3bb   : > { %v2919_v46 = vsel %vm509_vm3, %v5630_v14, %v5457_v48 }
 0x3be   : > { %3786 = vrot.lane.b32.xlu1 %v5299_v12, %s4600_s27  ;;  %3661 = vrot.lane.b32.xlu0 %v3372_v45, %s4599_s26  ;;  %v3915_v12 = vld [vmem:[%s5991_s7] sm:$0xf]  ;;  %v5640_v36 = vpop.permute.xlu1 %3030 }
 0x3c2   : > { %3798 = vrot.lane.b32.xlu1 %v3375_v20, %s4600_s27  ;;  %3669 = vrot.lane.b32.xlu0 %v3376_v25, %s4599_s26  ;;  %v5650_v32 = vpop.permute.xlu1 %3161 }
 0x3c6   : > { %3794 = vrot.lane.b32.xlu1 %v3373_v19, %s4600_s27  ;;  %3542 = vrot.lane.b32.xlu0 %v5533_v16, %s4598_s25 }
 0x3ca   : > { %3806 = vrot.lane.b32.xlu1 %v5546_v5, %s4600_s27  ;;  %3788 = vrot.lane.b32.xlu0 %v5281_v2, %s4600_s27  ;;  %v4040_v2 = vld [vmem:[%s5993_s9] sm:$0xf] }
 0x3ce   : > { %3802 = vrot.lane.b32.xlu1 %v5565_v31, %s4600_s27  ;;  %3677 = vrot.lane.b32.xlu0 %v3380_v28, %s4599_s26 }
 0x3d2   : > { %3918 = vperm.xlu1 %4568, %v3915_v12   ;;  %3673 = vrot.lane.b32.xlu0 %v5533_v16, %s4599_s26 }
 0x3d6   : > { %4043 = vperm.xlu1 %4568, %v4040_v2   ;;  %3796 = vrot.lane.b32.xlu0 %v3374_v3, %s4600_s27  ;;  %v3044_v3 = vsel %vm610_vm4, %v5469_v52, %v5473_v4  ;;  %v2914_v4 = vsel %vm509_vm3, %v5459_v9, %v5437_v54  ;;  %v4188_v9 = vld [vmem:[%s5990_s6 + $0x4] sm:$0x3] }
 0x3da   : > { %3792 = vrot.lane.b32.xlu0 %v3372_v45, %s4600_s27 }
 0x3dc   : > { %v2784_v37 = vpop.permute.xlu1 %2783 }
 0x3de   : > { %3804 = vrot.lane.b32.xlu0 %v5533_v16, %s4600_s27 }
 0x3e0   : > { %v5657_v61 = vpop.permute.xlu1 %3405  ;;  %v2786_v30 = vpop.permute.xlu0 %2785 }
 0x3e1   : > { %v2795_v43 = vsel %vm409_vm1, %v2784_v37, %v2786_v30 }
 0x3e2   : > { %3800 = vrot.lane.b32.xlu0 %v3376_v25, %s4600_s27  ;;  %4453 = vmatpush3.bf16.msra.mxu1 %v2795_v43 }
 0x3e3   : > { %4458 = vmatprep.subr.bf16.mxu1 %v6002_v24 }
 0x3e4   : > { %v5665_v0 = vpop.permute.xlu1 %3401  ;;  %v2913_v33 = vpop.permute.xlu0 %2912 }
 0x3e5   : > { %4455 = vmatmul.mubr.msk.bf16.vlgmr.msra.gmra.mrb[84].mxu1 %vm2805_vm10, %v4183_v41 }
 0x3e6   : > { %3808 = vrot.lane.b32.xlu0 %v3380_v28, %s4600_s27  ;;  %4459 = vmatpush3.bf16.msra.mxu1 %v2916_v40  ;;  %v2915_v28 = vsel %vm509_vm3, %v5437_v54, %v5455_v47  ;;  %v2918_v47 = vsel %vm509_vm3, %v5447_v44, %v5630_v14  ;;  %v2917_v54 = vsel %vm509_vm3, %v5461_v49, %v5447_v44 }
 0x3e7   : > { %4460 = vmatprep.subr.bf16.mxu1 %v6002_v24  ;;  %4464 = vmatprep.mubr.msk.bf16.mxu1 %vm4593_vm0, %v6002_v24  ;;  %v3043_v49 = vsel %vm610_vm4, %v5463_v50, %v5469_v52  ;;  %v3046_v52 = vsel %vm610_vm4, %v5467_v11, %v5640_v36 }
 0x3e8   : > { %v2911_v15 = vpop.permute.xlu1 %2910  ;;  %v3041_v63 = vpop.permute.xlu0 %3040 }
 0x3e9   : > { %v2922_v20 = vsel %vm509_vm3, %v2911_v15, %v2913_v33  ;;  %v3175_v33 = vsel %vm714_vm5, %v5483_v59, %v5638_v8  ;;  %v3178_v8 = vsel %vm714_vm5, %v5650_v32, %v5648_v22 }
 0x3ea   : > { %4461 = vmatpush3.bf16.msra.mxu1 %v2919_v46  ;;  %3942 = vrot.lane.b32.xlu0 %v4209_v42, %s4603_s29 }
 0x3eb   : > { %4462 = vmatprep.subr.bf16.mxu1 %v6002_v24 }
 0x3ec   : > { %v5682_v13 = vpop.permute.xlu1 %3413  ;;  %v5684_v34 = vpop.permute.xlu0 %3171 }
 0x3ee   : > { %4463 = vmatpush3.bf16.msra.mxu1 %v2922_v20 }
 0x3ef   : > { %4468 = vmatprep.subr.bf16.mxu1 %v6002_v24 }
 0x3f0   : > { %v5691_v19 = vpop.permute.xlu1 %3409  ;;  %v2782_v48 = vpop.permute.xlu0 %2781 }
 0x3f1   : > { %v2793_v45 = vsel %vm409_vm1, %v5451_v57, %v2782_v48  ;;  %v2794_v25 = vsel %vm409_vm1, %v2782_v48, %v2784_v37  ;;  %4465 = vmatmul.mubr.msk.bf16.vlgmr.msra.gmra.mrb[88].mxu1 %vm2805_vm10, %v2736_v7  ;;  %v3047_v57 = vsel %vm610_vm4, %v5640_v36, %v5479_v56  ;;  %v3177_v48 = vsel %vm714_vm5, %v5491_v27, %v5650_v32 }
 0x3f2   : > { %2813 = vmatprep.subr.bf16.mxu0 %v2794_v25  ;;  %4469 = vmatpush3.bf16.msra.mxu1 %v3044_v3  ;;  %v4194_v3 = vld [vmem:[%s5990_s6 + $0x8] sm:$0x3] }
 0x3f3   : > { %2814 = vmatpush1.bf16.msra.mxu0 %v2793_v45  ;;  %4470 = vmatprep.subr.bf16.mxu1 %v6002_v24 }
 0x3f4   : > { %v3039_v12 = vpop.permute.xlu1 %3038  ;;  %2935 = vmatprep.subr.bf16.mxu0 %v2915_v28  ;;  %v5704_v2 = vpop.permute.xlu0 %3403  ;;  %4474 = vmatprep.mubr.msk.bf16.mxu1 %vm4593_vm0, %v6002_v24  ;;  %v4576_v28 = vld [vmem:[#allocation2 + $0x10] sm:$0xff] }
 0x3f5   : > { %v3050_v56 = vsel %vm610_vm4, %v3039_v12, %v3041_v63 }
 0x3f6   : > { %4471 = vmatpush3.bf16.msra.mxu1 %v3047_v57  ;;  %4184 = vmatmul.mubr.msk.bf16.vlgmr.msra.gmra.mrb[84].mxu0 %vm2805_vm10, %v4183_v41  ;;  %v4577_v57 = vld [vmem:[#allocation2 + $0x8] sm:$0xff] }
 0x3f7   : > { %2936 = vmatpush1.bf16.msra.mxu0 %v2914_v4  ;;  %4472 = vmatprep.subr.bf16.mxu1 %v6002_v24  ;;  %v4578_v4 = vld [vmem:[#allocation2 + $0x38] sm:$0xff] }
 0x3f8   : > { %v5719_v37 = vpop.permute.xlu1 %3528  ;;  %2937 = vmatprep.subr.bf16.mxu0 %v2918_v47  ;;  %v2909_v30 = vpop.permute.xlu0 %2908  ;;  %2967 = vmatprep.mubr.bf16.mxu0 %v6003_v17 }
 0x3f9   : > { %v2921_v14 = vsel %vm509_vm3, %v2909_v30, %v2911_v15  ;;  %v2920_v44 = vsel %vm509_vm3, %v5465_v51, %v2909_v30  ;;  %v3042_v51 = vsel %vm610_vm4, %v5471_v53, %v5463_v50  ;;  %v4191_v50 = vld [vmem:[%s5990_s6 + $0x6] sm:$0x3] }
 0x3fa   : > { %4473 = vmatpush3.bf16.msra.mxu1 %v3050_v56  ;;  %v4197_v56 = vld [vmem:[%s5990_s6 + $0xa] sm:$0x3] }
 0x3fb   : > { %2938 = vmatpush1.bf16.msra.mxu0 %v2917_v54  ;;  %4478 = vmatprep.subr.bf16.mxu1 %v6002_v24  ;;  %v4579_v54 = vld [vmem:[#allocation2 + $0x30] sm:$0xff] }
 0x3fc   : > { %v5731_v43 = vpop.permute.xlu1 %3524  ;;  %2939 = vmatprep.subr.bf16.mxu0 %v2921_v14  ;;  %v3037_v41 = vpop.permute.xlu0 %3036 }
 0x3fd   : > { %4475 = vmatmul.mubr.msk.bf16.vlgmr.msra.gmra.mrb[92].mxu1 %vm2805_vm10, %v4188_v9  ;;  %v3049_v11 = vsel %vm610_vm4, %v3037_v41, %v3039_v12  ;;  %v3048_v46 = vsel %vm610_vm4, %v5481_v58, %v3037_v41  ;;  %v4575_v58 = vld [vmem:[#allocation2 + $0x40] sm:$0xff] }
 0x3fe   : > { %4479 = vmatpush3.bf16.msra.mxu1 %v3175_v33  ;;  %4484 = vmatprep.mubr.msk.bf16.mxu1 %vm4593_vm0, %v6002_v24  ;;  %v3418_v33 = vsel %vm915_vm6, %v5503_v38, %v5653_v21 }
 0x3ff   : > { %2940 = vmatpush1.bf16.msra.mxu0 %v2920_v44  ;;  %4480 = vmatprep.subr.bf16.mxu1 %v6002_v24 }
 0x400   : > { %v3170_v40 = vpop.permute.xlu1 %3169  ;;  %3063 = vmatprep.subr.bf16.mxu0 %v3043_v49  ;;  %v3168_v42 = vpop.permute.xlu0 %3167  ;;  %v3417_v49 = vsel %vm915_vm6, %v5507_v6, %v5503_v38  ;;  %v3420_v6 = vsel %vm915_vm6, %v5665_v0, %v5704_v2 }
 0x401   : > { %v3181_v22 = vsel %vm714_vm5, %v3170_v40, %v5684_v34  ;;  %v4574_v34 = vld [vmem:[#allocation2 + $0x18] sm:$0xff] }
 0x402   : > { %4186 = vmatmul.mubr.msk.bf16.vlgmr.msra.gmra.mrb[88].mxu0 %vm2805_vm10, %v2736_v7  ;;  %4481 = vmatpush3.bf16.msra.mxu1 %v3178_v8 }
 0x403   : > { %3064 = vmatpush1.bf16.msra.mxu0 %v3042_v51  ;;  %4482 = vmatprep.subr.bf16.mxu1 %v6002_v24 }
 0x404   : > { %v5756_v15 = vpop.permute.xlu1 %3536  ;;  %3065 = vmatprep.subr.bf16.mxu0 %v3046_v52  ;;  %v3400_v63 = vpop.permute.xlu0 %3399  ;;  %3095 = vmatprep.mubr.bf16.mxu0 %v6003_v17 }
 0x405   : > { %v3419_v45 = vsel %vm915_vm6, %v5653_v21, %v3400_v63 }
 0x406   : > { %4483 = vmatpush3.bf16.msra.mxu1 %v3181_v22 }
 0x407   : > { %3066 = vmatpush1.bf16.msra.mxu0 %v5477_v55  ;;  %4488 = vmatprep.subr.bf16.mxu1 %v6002_v24  ;;  %v3174_v55 = vsel %vm714_vm5, %v5485_v60, %v5483_v59 }
 0x408   : > { %v5767_v53 = vpop.permute.xlu1 %3532  ;;  %3067 = vmatprep.subr.bf16.mxu0 %v3049_v11  ;;  %v3408_v36 = vpop.permute.xlu0 %3407 }
 0x409   : > { %4485 = vmatmul.mubr.msk.bf16.vlgmr.msra.gmra.mrb[96].mxu1 %vm2805_vm10, %v4191_v50  ;;  %v3422_v12 = vsel %vm915_vm6, %v5657_v61, %v3408_v36 }
 0x40a   : > { %4489 = vmatpush3.bf16.msra.mxu1 %v4574_v34  ;;  %4494 = vmatprep.mubr.msk.bf16.mxu1 %vm4593_vm0, %v6002_v24 }
 0x40b   : > { %3068 = vmatpush1.bf16.msra.mxu0 %v3048_v46  ;;  %4490 = vmatprep.subr.bf16.mxu1 %v6002_v24 }
 0x40c   : > { %v5778_v20 = vpop.permute.xlu1 %3544  ;;  %3194 = vmatprep.subr.bf16.mxu0 %v3174_v55  ;;  %v5780_v7 = vpop.permute.xlu0 %3526 }
 0x40d   : > { %v3549_v0 = vsel %vm1019_vm7, %v5780_v7, %v5719_v37 }
 0x40e   : > { %4189 = vmatmul.mubr.msk.bf16.vlgmr.msra.gmra.mrb[92].mxu0 %vm2805_vm10, %v4188_v9  ;;  %4491 = vmatpush3.bf16.msra.mxu1 %v4575_v58 }
 0x40f   : > { %3195 = vmatpush1.bf16.msra.mxu0 %v5489_v62  ;;  %4492 = vmatprep.subr.bf16.mxu1 %v6002_v24  ;;  %v3180_v62 = vsel %vm714_vm5, %v3168_v42, %v3170_v40 }
 0x410   : > { %v5788_v59 = vpop.permute.xlu1 %3540  ;;  %3196 = vmatprep.subr.bf16.mxu0 %v3177_v48  ;;  %v3416_v60 = vpop.permute.xlu0 %3415  ;;  %3226 = vmatprep.mubr.bf16.mxu0 %v6003_v17 }
 0x411   : > { %v3425_v30 = vsel %vm915_vm6, %v5682_v13, %v3416_v60 }
 0x412   : > { %4493 = vmatpush3.bf16.msra.mxu1 %v5546_v5  ;;  %v3179_v5 = vsel %vm714_vm5, %v5501_v35, %v3168_v42  ;;  %v4200_v42 = vld [vmem:[%s5990_s6 + $0xc] sm:$0x3] }
 0x413   : > { %3197 = vmatpush1.bf16.msra.mxu0 %v5495_v1  ;;  %4498 = vmatprep.subr.bf16.mxu1 %v6002_v24 }
 0x414   : > { %v5798_v27 = vpop.permute.xlu1 %3659  ;;  %3198 = vmatprep.subr.bf16.mxu0 %v3180_v62  ;;  %v5800_v32 = vpop.permute.xlu0 %3534 }
 0x415   : > { %4495 = vmatmul.mubr.msk.bf16.vlgmr.msra.gmra.mrb[100].mxu1 %vm2805_vm10, %v4194_v3 }
 0x416   : > { %4499 = vmatpush3.bf16.msra.mxu1 %v3419_v45  ;;  %4504 = vmatprep.mubr.msk.bf16.mxu1 %vm4593_vm0, %v6002_v24 }
 0x417   : > { %3199 = vmatpush1.bf16.msra.mxu0 %v3179_v5  ;;  %4500 = vmatprep.subr.bf16.mxu1 %v6002_v24 }
 0x418   : > { %v5810_v1 = vpop.permute.xlu1 %3655  ;;  %v3531_v25 = vpop.permute.xlu0 %3530  ;;  %3283 = vmatprep.subr.bf16.mxu0 %v4576_v28 }
 0x419   : > { %v3550_v41 = vsel %vm1019_vm7, %v5719_v37, %v3531_v25  ;;  %v4203_v25 = vld [vmem:[%s5990_s6 + $0xe] sm:$0x3] }
 0x41a   : > { %4192 = vmatmul.mubr.msk.bf16.vlgmr.msra.gmra.mrb[96].mxu0 %vm2805_vm10, %v4191_v50  ;;  %4501 = vmatpush3.bf16.msra.mxu1 %v3422_v12 }
 0x41b   : > { %3284 = vmatpush1.bf16.msra.mxu0 %v4577_v57  ;;  %4502 = vmatprep.subr.bf16.mxu1 %v6002_v24 }
 0x41c   : > { %v5816_v35 = vpop.permute.xlu1 %3667  ;;  %3285 = vmatprep.subr.bf16.mxu0 %v4578_v4  ;;  %v3539_v47 = vpop.permute.xlu0 %3538  ;;  %3315 = vmatprep.mubr.bf16.mxu0 %v6003_v17 }
 0x41d   : > { %v3553_v44 = vsel %vm1019_vm7, %v5756_v15, %v3539_v47 }
 0x41e   : > { %4503 = vmatpush3.bf16.msra.mxu1 %v3425_v30 }
 0x41f   : > { %3286 = vmatpush1.bf16.msra.mxu0 %v4579_v54  ;;  %4508 = vmatprep.subr.bf16.mxu1 %v6002_v24 }
 0x420   : > { %v5825_v9 = vpop.permute.xlu1 %3663  ;;  %3287 = vmatprep.subr.bf16.mxu0 %v5533_v16  ;;  %v5828_v14 = vpop.permute.xlu0 %3657 }
 0x421   : > { %4505 = vmatmul.mubr.msk.bf16.vlgmr.msra.gmra.mrb[104].mxu1 %vm2805_vm10, %v4197_v56  ;;  %v3680_v58 = vsel %vm1123_vm8, %v5828_v14, %v5798_v27 }
 0x422   : > { %4509 = vmatpush3.bf16.msra.mxu1 %v3550_v41  ;;  %4514 = vmatprep.mubr.msk.bf16.mxu1 %vm4593_vm0, %v6002_v24 }
 0x423   : > { %3288 = vmatpush1.bf16.msra.mxu0 %v5565_v31  ;;  %4510 = vmatprep.subr.bf16.mxu1 %v6002_v24  ;;  %v3421_v31 = vsel %vm915_vm6, %v5704_v2, %v5657_v61 }
 0x424   : > { %3438 = vmatprep.subr.bf16.mxu0 %v3418_v33  ;;  %v3547_v16 = vpop.permute.xlu0 %3546  ;;  %v5845_v40 = vpop.permute.xlu1 %3675 }
 0x425   : > { %v3556_v38 = vsel %vm1019_vm7, %v5778_v20, %v3547_v16 }
 0x426   : > { %4195 = vmatmul.mubr.msk.bf16.vlgmr.msra.gmra.mrb[100].mxu0 %vm2805_vm10, %v4194_v3  ;;  %4511 = vmatpush3.bf16.msra.mxu1 %v3553_v44 }
 0x427   : > { %3439 = vmatpush1.bf16.msra.mxu0 %v3417_v49  ;;  %4512 = vmatprep.subr.bf16.mxu1 %v6002_v24 }
 0x428   : > { %3440 = vmatprep.subr.bf16.mxu0 %v3421_v31  ;;  %v5852_v21 = vpop.permute.xlu0 %3665  ;;  %3470 = vmatprep.mubr.bf16.mxu0 %v6003_v17  ;;  %v5864_v61 = vpop.permute.xlu1 %3671 }
 0x42a   : > { %4513 = vmatpush3.bf16.msra.mxu1 %v3556_v38 }
 0x42b   : > { %3441 = vmatpush1.bf16.msra.mxu0 %v3420_v6  ;;  %4518 = vmatprep.subr.bf16.mxu1 %v6002_v24 }
 0x42c   : > { %v3412_v8 = vpop.permute.xlu0 %3411  ;;  %v5881_v22 = vpop.permute.xlu1 %3790 }
 0x42d   : > { %v3423_v51 = vsel %vm915_vm6, %v5691_v19, %v3412_v8  ;;  %4515 = vmatmul.mubr.msk.bf16.vlgmr.msra.gmra.mrb[108].mxu1 %vm2805_vm10, %v4200_v42  ;;  %v3424_v52 = vsel %vm915_vm6, %v3412_v8, %v5682_v13  ;;  %v3548_v19 = vsel %vm1019_vm7, %v5731_v43, %v5780_v7  ;;  %v3552_v13 = vsel %vm1019_vm7, %v5800_v32, %v5756_v15 }
 0x42e   : > { %3442 = vmatprep.subr.bf16.mxu0 %v3424_v52  ;;  %4524 = vmatprep.mubr.msk.bf16.mxu1 %vm4593_vm0, %v6002_v24  ;;  %v3551_v43 = vsel %vm1019_vm7, %v5767_v53, %v5800_v32 }
 0x42f   : > { %3443 = vmatpush1.bf16.msra.mxu0 %v3423_v51 }
 0x430   : > { %3569 = vmatprep.subr.bf16.mxu0 %v3549_v0  ;;  %v3662_v2 = vpop.permute.xlu0 %3661  ;;  %v3787_v11 = vpop.permute.xlu1 %3786 }
 0x431   : > { %v3681_v63 = vsel %vm1123_vm8, %v5798_v27, %v3662_v2  ;;  %v3683_v27 = vsel %vm1123_vm8, %v5852_v21, %v5816_v35 }
 0x432   : > { %4198 = vmatmul.mubr.msk.bf16.vlgmr.msra.gmra.mrb[104].mxu0 %vm2805_vm10, %v4197_v56  ;;  %4519 = vmatpush3.bf16.msra.mxu1 %v3681_v63 }
 0x433   : > { %3570 = vmatpush1.bf16.msra.mxu0 %v3548_v19  ;;  %4520 = vmatprep.subr.bf16.mxu1 %v6002_v24 }
 0x434   : > { %3571 = vmatprep.subr.bf16.mxu0 %v3552_v13  ;;  %v3670_v37 = vpop.permute.xlu0 %3669  ;;  %3601 = vmatprep.mubr.bf16.mxu0 %v6003_v17 }
 0x435   : > { %v3684_v50 = vsel %vm1123_vm8, %v5816_v35, %v3670_v37 }
 0x436   : > { %4521 = vmatpush3.bf16.msra.mxu1 %v3684_v50 }
 0x437   : > { %3572 = vmatpush1.bf16.msra.mxu0 %v3551_v43  ;;  %4522 = vmatprep.subr.bf16.mxu1 %v6002_v24 }
 0x438   : > { %v3543_v36 = vpop.permute.xlu0 %3542 }
 0x439   : > { %v2686_v15 = vpop.f32.mrb[80].mxu0  ;;  %v3554_v46 = vsel %vm1019_vm7, %v5788_v59, %v3543_v36  ;;  %v3555_v34 = vsel %vm1019_vm7, %v3543_v36, %v5778_v20  ;;  %v3799_v20 = vpop.permute.xlu1 %3798 }
 0x43a   : > { %v5900_v55 = vadd.f32 %v2686_v15, %v5441_v26  ;;  %v2688_v7 = vpop.f32.mrb[81].mxu0  ;;  %3573 = vmatprep.subr.bf16.mxu0 %v3555_v34  ;;  %v3679_v26 = vsel %vm1123_vm8, %v5810_v1, %v5828_v14 }
 0x43b   : > { %v5903_v53 = vadd.f32 %v2688_v7, %v5445_v10  ;;  %3574 = vmatpush1.bf16.msra.mxu0 %v3554_v46  ;;  %v2690_v48 = vpop.f32.mrb[82].mxu0 }
 0x43c   : > { %3700 = vmatprep.subr.bf16.mxu0 %v3680_v58  ;;  %v3789_v60 = vpop.permute.xlu0 %3788  ;;  %v2691_v3 = vpop.f32.mrb[83].mxu0 }
 0x43d   : > { %v2727_v59 = vpop.f32.mrb[80].mxu1  ;;  %v3795_v28 = vpop.permute.xlu1 %3794  ;;  %v3811_v4 = vsel %vm1227_vm9, %v3789_v60, %v5881_v22  ;;  %v3810_v56 = vsel %vm1227_vm9, %v3787_v11, %v3789_v60 }
 0x43e   : > { %v5912_v62 = vadd.f32 %v2727_v59, %v5439_v39  ;;  %4201 = vmatmul.mubr.msk.bf16.vlgmr.msra.gmra.mrb[108].mxu0 %vm2805_vm10, %v4200_v42  ;;  %v4446_v10 = vpop.f32.mrb[81].mxu1  ;;  %v3682_v39 = vsel %vm1123_vm8, %v5825_v9, %v5852_v21 }
 0x43f   : > { %3701 = vmatpush1.bf16.msra.mxu0 %v3679_v26  ;;  %3732 = vmatprep.mubr.bf16.mxu0 %v6003_v17  ;;  %v2730_v32 = vpop.f32.mrb[82].mxu1 }
 0x440   : > { %3702 = vmatprep.subr.bf16.mxu0 %v3683_v27  ;;  %v3678_v45 = vpop.permute.xlu0 %3677  ;;  %v4447_v1 = vpop.f32.mrb[83].mxu1 }
 0x441   : > { %v3687_v5 = vsel %vm1123_vm8, %v5845_v40, %v3678_v45  ;;  %v3807_v30 = vpop.permute.xlu1 %3806 }
 0x442   : > { %4523 = vmatpush3.bf16.msra.mxu1 %v3687_v5 }
 0x443   : > { %3703 = vmatpush1.bf16.msra.mxu0 %v3682_v39  ;;  %4528 = vmatprep.subr.bf16.mxu1 %v6002_v24 }
 0x444   : > { %v3674_v12 = vpop.permute.xlu0 %3673 }
 0x445   : > { %v3685_v57 = vsel %vm1123_vm8, %v5864_v61, %v3674_v12  ;;  %4525 = vmatmul.mubr.msk.bf16.vlgmr.msra.gmra.mrb[112].mxu1 %vm2805_vm10, %v4203_v25  ;;  %v3686_v35 = vsel %vm1123_vm8, %v3674_v12, %v5845_v40  ;;  %v3803_v33 = vpop.permute.xlu1 %3802  ;;  %v4206_v40 = vld [vmem:[%s5990_s6 + $0x10] sm:$0x3] }
 0x446   : > { %3704 = vmatprep.subr.bf16.mxu0 %v3686_v35  ;;  %4534 = vmatprep.mubr.msk.bf16.mxu1 %vm4593_vm0, %v6002_v24 }
 0x447   : > { %3705 = vmatpush1.bf16.msra.mxu0 %v3685_v57 }
 0x448   : > { %3831 = vmatprep.subr.bf16.mxu0 %v3811_v4  ;;  %v3797_v47 = vpop.permute.xlu0 %3796 }
 0x449   : > { %v3814_v54 = vsel %vm1227_vm9, %v3797_v47, %v3799_v20  ;;  %v3813_v41 = vsel %vm1227_vm9, %v3795_v28, %v3797_v47 }
 0x44a   : > { %4204 = vmatmul.mubr.msk.bf16.vlgmr.msra.gmra.mrb[112].mxu0 %vm2805_vm10, %v4203_v25 }
 0x44b   : > { %3832 = vmatpush1.bf16.msra.mxu0 %v3810_v56  ;;  %3863 = vmatprep.mubr.bf16.mxu0 %v6003_v17 }
 0x44c   : > { %3833 = vmatprep.subr.bf16.mxu0 %v3814_v54  ;;  %v3793_v9 = vpop.permute.xlu0 %3792 }
 0x44d   : > { %v3812_v14 = vsel %vm1227_vm9, %v5881_v22, %v3793_v9 }
 0x44e   : > { %4529 = vmatpush3.bf16.msra.mxu1 %v3812_v14 }
 0x44f   : > { %3834 = vmatpush1.bf16.msra.mxu0 %v3813_v41  ;;  %4530 = vmatprep.subr.bf16.mxu1 %v6002_v24 }
 0x450   : > { %v3805_v16 = vpop.permute.xlu0 %3804 }
 0x451   : > { %v3816_v44 = vsel %vm1227_vm9, %v3803_v33, %v3805_v16  ;;  %v3817_v49 = vsel %vm1227_vm9, %v3805_v16, %v3807_v30 }
 0x452   : > { %3835 = vmatprep.subr.bf16.mxu0 %v3817_v49 }
 0x453   : > { %3836 = vmatpush1.bf16.msra.mxu0 %v3816_v44 }
 0x454   : > { %v3801_v31 = vpop.permute.xlu0 %3800 }
 0x455   : > { %v3815_v21 = vsel %vm1227_vm9, %v3799_v20, %v3801_v31 }
 0x456   : > { %4207 = vmatmul.mubr.msk.bf16.vlgmr.msra.gmra.mrb[116].mxu0 %vm2805_vm10, %v4206_v40  ;;  %4531 = vmatpush3.bf16.msra.mxu1 %v3815_v21 }
 0x457   : > { %4532 = vmatprep.subr.bf16.mxu1 %v6002_v24  ;;  %3988 = vmatprep.mubr.bf16.mxu0 %v6003_v17 }
 0x458   : > { %v3809_v38 = vpop.permute.xlu0 %3808 }
 0x459   : > { %v3818_v6 = vsel %vm1227_vm9, %v3807_v30, %v3809_v38 }
 0x45a   : > { %4533 = vmatpush3.bf16.msra.mxu1 %v3818_v6 }
 0x45b   : > { %4538 = vmatprep.subr.bf16.mxu1 %v6002_v24 }
 0x45d   : > { %4535 = vmatmul.mubr.msk.bf16.vlgmr.msra.gmra.mrb[116].mxu1 %vm2805_vm10, %v4206_v40 }
 0x45e   : > { %4540 = vmatprep.mubr.msk.bf16.mxu1 %vm4593_vm0, %v6002_v24 }
 0x4b8   : > { %v2884_v42 = vpop.f32.mrb[84].mxu1 }
 0x4b9   : > { %v4456_v61 = vpop.f32.mrb[85].mxu1 }
 0x4ba   : > { %v2887_v8 = vpop.f32.mrb[86].mxu1 }
 0x4bb   : > { %v4457_v51 = vpop.f32.mrb[87].mxu1 }
 0x4c4   : > { %v3010_v52 = vpop.f32.mrb[88].mxu1 }
 0x4c5   : > { %v3011_v0 = vadd.f32 %v3010_v52, %v2884_v42  ;;  %v4466_v2 = vpop.f32.mrb[89].mxu1 }
 0x4c6   : > { %v3013_v63 = vpop.f32.mrb[90].mxu1 }
 0x4c7   : > { %v4467_v17 = vpop.f32.mrb[91].mxu1 }
 0x4c9   : > { %v2843_v19 = vpop.f32.mrb[84].mxu0 }
 0x4ca   : > { %v2845_v22 = vpop.f32.mrb[85].mxu0 }
 0x4cb   : > { %v2847_v13 = vpop.f32.mrb[86].mxu0 }
 0x4cc   : > { %v2848_v37 = vpop.f32.mrb[87].mxu0 }
 0x4d0   : > { %v3138_v50 = vpop.f32.mrb[92].mxu1 }
 0x4d1   : > { %v3146_v43 = vadd.f32 %v3138_v50, %v3011_v0  ;;  %v4476_v11 = vpop.f32.mrb[93].mxu1 }
 0x4d2   : > { %v3141_v36 = vpop.f32.mrb[94].mxu1 }
 0x4d3   : > { %v4477_v15 = vpop.f32.mrb[95].mxu1 }
 0x4d5   : > { %v2969_v46 = vpop.f32.mrb[88].mxu0 }
 0x4d6   : > { %v2970_v24 = vadd.f32 %v2969_v46, %v2843_v19  ;;  %v2971_v34 = vpop.f32.mrb[89].mxu0 }
 0x4d7   : > { %v2972_v7 = vadd.f32 %v2971_v34, %v2845_v22  ;;  %v2973_v58 = vpop.f32.mrb[90].mxu0 }
 0x4d8   : > { %v2974_v48 = vpop.f32.mrb[91].mxu0 }
 0x4dc   : > { %v3269_v60 = vpop.f32.mrb[96].mxu1 }
 0x4dd   : > { %v3277_v59 = vadd.f32 %v3269_v60, %v3146_v43  ;;  %v4486_v3 = vpop.f32.mrb[97].mxu1 }
 0x4de   : > { %v3272_v26 = vpop.f32.mrb[98].mxu1 }
 0x4df   : > { %v4487_v20 = vpop.f32.mrb[99].mxu1 }
 0x4e1   : > { %v3097_v10 = vpop.f32.mrb[92].mxu0 }
 0x4e2   : > { %v3144_v27 = vadd.f32 %v3097_v10, %v2970_v24  ;;  %v3099_v32 = vpop.f32.mrb[93].mxu0 }
 0x4e3   : > { %v3145_v45 = vadd.f32 %v3099_v32, %v2972_v7  ;;  %v3101_v5 = vpop.f32.mrb[94].mxu0 }
 0x4e4   : > { %v3102_v1 = vpop.f32.mrb[95].mxu0 }
 0x4e8   : > { %v3358_v39 = vpop.f32.mrb[100].mxu1 }
 0x4e9   : > { %v3366_v25 = vadd.f32 %v3358_v39, %v3277_v59  ;;  %v4496_v28 = vpop.f32.mrb[101].mxu1 }
 0x4ea   : > { %v3361_v12 = vpop.f32.mrb[102].mxu1 }
 0x4eb   : > { %v4497_v57 = vpop.f32.mrb[103].mxu1 }
 0x4ed   : > { %v3228_v35 = vpop.f32.mrb[96].mxu0 }
 0x4ee   : > { %v3275_v4 = vadd.f32 %v3228_v35, %v3144_v27  ;;  %v3230_v47 = vpop.f32.mrb[97].mxu0  ;;  %v3919_v27 = vpop.permute.xlu1 %3918 }
 0x4ef   : > { %v3276_v30 = vadd.f32 %v3230_v47, %v3145_v45  ;;  %v3232_v56 = vpop.f32.mrb[98].mxu0 }
 0x4f0   : > { %v3233_v54 = vpop.f32.mrb[99].mxu0 }
 0x4f4   : > { %v3513_v9 = vpop.f32.mrb[104].mxu1 }
 0x4f5   : > { %v3521_v14 = vadd.f32 %v3513_v9, %v3366_v25  ;;  %v4506_v41 = vpop.f32.mrb[105].mxu1 }
 0x4f6   : > { %v3516_v33 = vpop.f32.mrb[106].mxu1 }
 0x4f7   : > { %v4507_v16 = vpop.f32.mrb[107].mxu1 }
 0x4f8   : > { %v3943_v16 = vpop.permute.xlu0 %3942 }
 0x4f9   : > { %v3317_v44 = vpop.f32.mrb[100].mxu0 }
 0x4fa   : > { %v3364_v49 = vadd.f32 %v3317_v44, %v3275_v4  ;;  %v3319_v40 = vpop.f32.mrb[101].mxu0 }
 0x4fb   : > { %v3365_v31 = vadd.f32 %v3319_v40, %v3276_v30  ;;  %v3321_v21 = vpop.f32.mrb[102].mxu0 }
 0x4fc   : > { %v3322_v38 = vpop.f32.mrb[103].mxu0  ;;  %v4044_v21 = vpop.permute.xlu1 %4043 }
 0x500   : > { %v3644_v6 = vpop.f32.mrb[108].mxu1 }
 0x501   : > { %v3652_v42 = vadd.f32 %v3644_v6, %v3521_v14  ;;  %v4516_v61 = vpop.f32.mrb[109].mxu1 }
 0x502   : > { %v3647_v8 = vpop.f32.mrb[110].mxu1 }
 0x503   : > { %v4517_v51 = vpop.f32.mrb[111].mxu1  ;;  %v4580_v8 = vld [vmem:[%s4699_s19] sm:$0xff] }
 0x505   : > { %v3472_v52 = vpop.f32.mrb[104].mxu0 }
 0x506   : > { %v3519_v0 = vadd.f32 %v3472_v52, %v3364_v49  ;;  %v3474_v2 = vpop.f32.mrb[105].mxu0  ;;  %v6004_v52 = vld [vmem:[#allocation3_spill] sm:$0xff] }
 0x507   : > { %v3520_v63 = vadd.f32 %v3474_v2, %v3365_v31  ;;  %v3476_v17 = vpop.f32.mrb[106].mxu0 }
 0x508   : > { %v3477_v19 = vpop.f32.mrb[107].mxu0 }
 0x511   : > { %v3603_v22 = vpop.f32.mrb[108].mxu0 }
 0x512   : > { %v3650_v13 = vadd.f32 %v3603_v22, %v3519_v0  ;;  %v3605_v37 = vpop.f32.mrb[109].mxu0 }
 0x513   : > { %v3651_v50 = vadd.f32 %v3605_v37, %v3520_v63  ;;  %v3607_v43 = vpop.f32.mrb[110].mxu0 }
 0x514   : > { %v3608_v11 = vpop.f32.mrb[111].mxu0 }
 0x518   : > { %v3775_v36 = vpop.f32.mrb[112].mxu1 }
 0x519   : > { %v3783_v15 = vadd.f32 %v3775_v36, %v3652_v42  ;;  %v4526_v46 = vpop.f32.mrb[113].mxu1 }
 0x51a   : > { %v3778_v24 = vpop.f32.mrb[114].mxu1 }
 0x51b   : > { %v4527_v34 = vpop.f32.mrb[115].mxu1 }
 0x51d   : > { %v3734_v7 = vpop.f32.mrb[112].mxu0 }
 0x51e   : > { %v3781_v58 = vadd.f32 %v3734_v7, %v3650_v13  ;;  %v3736_v48 = vpop.f32.mrb[113].mxu0  ;;  %v4581_v13 = vld [vmem:[%s4699_s19 + $0x8] sm:$0xf] }
 0x51f   : > { %v3782_v60 = vadd.f32 %v3736_v48, %v3651_v50  ;;  %v3738_v59 = vpop.f32.mrb[114].mxu0 }
 0x520   : > { %v3739_v3 = vpop.f32.mrb[115].mxu0 }
 0x529   : > { %v3865_v26 = vpop.f32.mrb[116].mxu0 }
 0x52a   : > { %v3912_v20 = vadd.f32 %v3865_v26, %v3781_v58  ;;  %v3867_v10 = vpop.f32.mrb[117].mxu0 }
 0x52b   : > { %v3913_v32 = vadd.f32 %v3867_v10, %v3782_v60  ;;  %v3869_v45 = vpop.f32.mrb[118].mxu0 }
 0x52c   : > { %v3921_v5 = vadd.f32 %v3919_v27, %v3912_v20  ;;  %v3870_v1 = vpop.f32.mrb[119].mxu0 }
 0x52d   : > { %v3922_v39 = vadd.f32 %v3919_v27, %v3913_v32 }
 0x52e   : > { %v3924_v25 = vmax.f32 %v3921_v5, 0.0 }
 0x52f   : > { %v3925_v28 = vmax.f32 %v3922_v39, 0.0 }
 0x530   : > { %v3927_v12 = vsel %vm1346_vm12, %v3924_v25, 0.0  ;;  %v3906_v57 = vpop.f32.mrb[116].mxu1 }
 0x531   : > { %v3930_v35 = vpack.c.bf16 %v3927_v12, %v3927_v12  ;;  %v3928_v4 = vsel %vm1347_vm13, %v3925_v28, 0.0  ;;  %v3914_v47 = vadd.f32 %v3906_v57, %v3783_v15  ;;  %v4536_v30 = vpop.f32.mrb[117].mxu1 }
 0x532   : > { %v3931_v56 = vpack.c.bf16 %v3928_v4, %v3928_v4  ;;  %v3909_v54 = vpop.f32.mrb[118].mxu1 }
 0x533   : > { %v3923_v9 = vadd.f32 %v3919_v27, %v3914_v47  ;;  %v4537_v14 = vpop.f32.mrb[119].mxu1  ;;  %v3948_v41 = vsel %vm1373_vm14, %v3930_v35, 0 }
 0x534   : > { %4210 = vmatprep.subr.msk.bf16.mxu0 %vm1373_vm14, %v3931_v56 }
 0x535   : > { %v3926_v33 = vmax.f32 %v3923_v9, 0.0  ;;  %3957 = vmatpush1.bf16.msra.mxu0 %v3948_v41 }
 0x537   : > { %v3929_v23 = vsel %vm1348_vm11, %v3926_v33, 0.0 }
 0x538   : > { %v3932_v44 = vpack.c.bf16 %v3929_v23, %v3929_v23  ;;  %4211 = vmatmul.mubr.msk.bf16.vlgmr.msra.gmra.mrb[120].mxu0 %vm1369_vm15, %v3943_v16 }
 0x53a   : > { %v3954_v29 = vsel %vm1373_vm14, %v3932_v44, 0 }
 0x53b   : > { %4539 = vmatpush3.bf16.msra.mxu1 %v3954_v29 }
 0x53e   : > { %4541 = vmatmul.mubr.msk.bf16.vlgmr.msra.gmra.mrb[120].mxu1 %vm1369_vm15, %v3943_v16 }
 0x60b   : > { %v3990_v49 = vpop.f32.mrb[120].mxu0 }
 0x60c   : > { %v4037_v40 = vadd.f32 %v3990_v49, %v5900_v55  ;;  %v3992_v31 = vpop.f32.mrb[121].mxu0 }
 0x60d   : > { %v4038_v38 = vadd.f32 %v3992_v31, %v5903_v53  ;;  %v3994_v6 = vpop.f32.mrb[122].mxu0 }
 0x60e   : > { %v4046_v18 = vadd.f32 %v4044_v21, %v4037_v40  ;;  %v3995_v42 = vpop.f32.mrb[123].mxu0 }
 0x60f   : > { %v4047_v61 = vadd.f32 %v4044_v21, %v4038_v38 }
 0x610   : > { %v4049_v51 = vadd.f32 %v4580_v8, %v4046_v18 }
 0x611   : > { %v4050_v0 = vadd.f32 %v4047_v61, %v6004_v52  ;;  %v4031_v2 = vpop.f32.mrb[120].mxu1 }
 0x612   : > { %v4039_v55 = vadd.f32 %v4031_v2, %v5912_v62  ;;  %v4542_v63 = vpop.f32.mrb[121].mxu1 }
 0x613   : > { %v4054_v17 = vcombine.low %v4049_v51, %v4050_v0  ;;  %v4034_v53 = vpop.f32.mrb[122].mxu1 }
 0x614   : > { %v4048_v19 = vadd.f32 %v4044_v21, %v4039_v55  ;;  %v4543_v22 = vpop.f32.mrb[123].mxu1 }
 0x615   : > { %4056 = vst [vmem:[%s359_s11] sm:$0xff] %v4054_v17 }
 0x616   : > { %v4051_v37 = vadd.f32 %v4581_v13, %v4048_v19 }
 0x618   : > { %4057 = vst [vmem:[%s359_s11 + $0x8] sm:$0xf] %v4051_v37 }
 0x619 PF: > { %s20_s13 = sadd.s32 1, %s4588_s13  }
 0x61a   : > { %p17_p4 = scmp.ge.s32.totalorder %s20_s13, 4  }
 0x61c   :  { %19 = sbr.rel (!%p17_p4) target bundleno = 1 (0x1), region = 114 }

</bundles_post_ra>
